<compile_context>
chip_gen: v7x
topology: tpu7x:2x2x1
jax: 0.10.0
libtpu: 0.0.40
codegen_flags: <defaults>
</compile_context>

<pallas_src>
import math

import jax
import jax.numpy as jnp
from jax.experimental import pallas as pl
from jax.experimental.pallas import tpu as pltpu

# ---- scaled-down MiniLM-L12-v2-style config (real: H=384, L=12, NH=12, I=1536)
VOCAB = 100
MAX_POS = 32
H = 128           # hidden size (lane-dense: multiple of 128)
NH = 4            # attention heads
DH = H // NH      # head dim (= 32, same as the real model)
FF = 256          # intermediate (FFN) size
L = 2             # transformer layers
LN_EPS = 1e-12    # BERT layernorm eps

# packed per-layer vector rows (each padded to FF lanes)
(V_BQ, V_BK, V_BV, V_BO, V_B1, V_B2, V_G1, V_BE1, V_G2, V_BE2) = range(10)
NVEC = 10


# ----------------------------- shared math helpers ---------------------------
def _layernorm(x, g, b):
    mu = jnp.mean(x, axis=-1, keepdims=True)
    var = jnp.mean((x - mu) ** 2, axis=-1, keepdims=True)
    return (x - mu) * jax.lax.rsqrt(var + LN_EPS) * g + b


# ------------------------------- fused kernel --------------------------------
def fused_encoder_kernel(x_ref, maskf_ref, bias_ref, egb_ref, wqkv_ref, wo_ref,
                         w1_ref, w2_ref, vecs_ref, out_ref):
    """Embedding-LN -> L encoder layers -> masked mean pooling, fully in VMEM.

    Processes one batch block of BB sequences per grid step as a flattened
    (M = BB*S, H) lane-dense slab; all layer weights are VMEM-resident bf16.
    """
    f32 = jnp.float32
    bf16 = jnp.bfloat16
    M = x_ref.shape[0]            # BB*S rows in this batch block
    BB = out_ref.shape[0]
    S = M // BB

    x = x_ref[...].astype(f32)                       # (M, H) summed embeddings
    mflat = maskf_ref[...].astype(f32)               # (M, 1), values in {0, 1}
    bias = bias_ref[0]                               # (M, M) additive attn bias

    egb = egb_ref[...]                               # (2, H): [gamma; beta]
    x = _layernorm(x, egb[0:1, :], egb[1:2, :])      # embedding LayerNorm

    def layer(l, x):
        vl = vecs_ref[l]                             # (NVEC, FF) packed vectors
        bq = vl[V_BQ:V_BQ + 1, :H]
        bk = vl[V_BK:V_BK + 1, :H]
        bv = vl[V_BV:V_BV + 1, :H]
        bo = vl[V_BO:V_BO + 1, :H]
        b1 = vl[V_B1:V_B1 + 1, :FF]
        b2 = vl[V_B2:V_B2 + 1, :H]
        g1, be1 = vl[V_G1:V_G1 + 1, :H], vl[V_BE1:V_BE1 + 1, :H]
        g2, be2 = vl[V_G2:V_G2 + 1, :H], vl[V_BE2:V_BE2 + 1, :H]

        # fused QKV projection: one bf16 (M,H)@(H,3H) MXU matmul, f32 accumulate
        qkv = jnp.dot(x.astype(bf16), wqkv_ref[l],
                      preferred_element_type=f32)    # (M, 3H)
        q = qkv[:, 0:H] + bq        # 1/sqrt(DH) already folded into wqkv / bq
        k = qkv[:, H:2 * H] + bk
        v = qkv[:, 2 * H:3 * H] + bv

        # heads batched on the leading dim -> batched MXU contractions over all
        # BB sequences at once.  TODO(synk): use pltpu.einshape('m(hd)->hmd')
        # here once grouped-equation support is confirmed.
        qh = jnp.stack([q[:, h * DH:(h + 1) * DH] for h in range(NH)], 0).astype(bf16)
        kh = jnp.stack([k[:, h * DH:(h + 1) * DH] for h in range(NH)], 0).astype(bf16)
        vh = jnp.stack([v[:, h * DH:(h + 1) * DH] for h in range(NH)], 0).astype(bf16)

        s = jnp.einsum('hqd,hkd->hqk', qh, kh,
                       preferred_element_type=f32)   # (NH, M, M)
        # block-diagonal + key-mask bias (0 / -1e9), hoisted out of the loop
        s = s + bias[None, :, :]
        s = s - jnp.max(s, axis=-1, keepdims=True)   # f32 softmax statistics
        p = jnp.exp(s)
        p = p * pl.reciprocal(jnp.sum(p, axis=-1, keepdims=True), approx=True)
        ctx = jnp.einsum('hqk,hkd->hqd', p.astype(bf16), vh,
                         preferred_element_type=f32)  # (NH, M, DH)

        # concat heads back to (M, H); one full-width output projection (K = H)
        ctx2 = jnp.concatenate([ctx[h] for h in range(NH)], axis=-1)
        attn = jnp.dot(ctx2.astype(bf16), wo_ref[l],
                       preferred_element_type=f32) + bo
        h1 = _layernorm(attn + x, g1, be1)

        ff = jnp.dot(h1.astype(bf16), w1_ref[l],
                     preferred_element_type=f32) + b1
        # TODO(synk): HF BERT/MiniLM uses exact erf GELU; tanh-approx GELU kept.
        ff = jax.nn.gelu(ff, approximate=True)
        ff = jnp.dot(ff.astype(bf16), w2_ref[l],
                     preferred_element_type=f32) + b2
        return _layernorm(ff + h1, g2, be2)

    # fori_loop (not an unrolled Python for) bounds live ranges / code size.
    x = jax.lax.fori_loop(0, L, layer, x)

    # masked mean pooling on the VPU (matches torch.clamp(min=1e-9) semantics);
    # no f32xf32 MXU matmul in the epilogue.
    masked = x * mflat                                # (M, H)
    for b in range(BB):                               # BB is static & small
        rows = masked[b * S:(b + 1) * S, :]           # sublane-aligned slice
        denom = jnp.maximum(jnp.sum(mflat[b * S:(b + 1) * S, :]), 1e-9)
        out_ref[b] = (jnp.sum(rows, axis=0, keepdims=True) / denom
                      ).astype(out_ref.dtype)


# ------------------------------- host wrapper ---------------------------------
def _replicated_spec(shape):
    nd = len(shape)
    return pl.BlockSpec(shape, lambda g, _nd=nd: (0,) * _nd)


def _pick_bb(batch, seq):
    """Largest divisor of `batch` with bb*seq >= 256 when possible (MXU fill)."""
    target = max(1, -(-256 // seq))       # ceil(256 / seq)
    bb = min(batch, target)
    while batch % bb:
        bb -= 1
    return max(bb, 1)


@jax.jit
def encoder_forward(input_ids, attention_mask, params):
    """Equivalent of STAllEnglishMiniLML12V2Encoder.forward(text_input)."""
    word_emb, pos_emb, type_emb, egb, wqkv, wo, w1, w2, vecs = params
    B, S = input_ids.shape
    BB = _pick_bb(B, S)                   # sequences per grid step
    G = B // BB                           # grid size (batch blocks)
    M = BB * S                            # rows per grid step

    # embedding gathers + mask/bias layout prep are glue (plain JAX);
    # embedding-LN + all L encoder layers + pooling run inside the Pallas kernel.
    x = (word_emb[input_ids]
         + pos_emb[:S][None, :, :]
         + type_emb[0][None, None, :]).astype(jnp.float32)       # (B, S, H)
    x_flat = x.reshape(B * S, H)                                  # lane-dense rows

    mask_f = attention_mask.astype(jnp.float32)                   # (B, S)
    mask_flat = mask_f.reshape(B * S, 1)                           # pooling weights

    # block-diagonal additive attention bias per batch block: 0 where the key is
    # in the same sequence AND unmasked, -1e9 otherwise.  Cross-sequence logits
    # underflow to exactly 0 after softmax, so flattening BB sequences onto one
    # (M, M) attention is numerically exact for non-degenerate masks.
    seq_ids = jnp.repeat(jnp.arange(BB, dtype=jnp.int32), S)       # (M,)
    same_seq = seq_ids[:, None] == seq_ids[None, :]                # (M, M)
    key_keep = mask_f.reshape(G, 1, M) > 0.5                       # (G, 1, M)
    attn_bias = jnp.where(jnp.logical_and(same_seq[None], key_keep),
                          0.0, -1e9).astype(jnp.float32)           # (G, M, M)

    pooled = pl.pallas_call(
        fused_encoder_kernel,
        out_shape=jax.ShapeDtypeStruct((B, 1, H), jnp.float32),
        grid=(G,),
        in_specs=[pl.BlockSpec((M, H), lambda g: (g, 0)),          # activations
                  pl.BlockSpec((M, 1), lambda g: (g, 0)),          # pooling mask
                  pl.BlockSpec((1, M, M), lambda g: (g, 0, 0)),    # attn bias
                  _replicated_spec(egb.shape),
                  _replicated_spec(wqkv.shape),
                  _replicated_spec(wo.shape),
                  _replicated_spec(w1.shape),
                  _replicated_spec(w2.shape),
                  _replicated_spec(vecs.shape)],
        out_specs=pl.BlockSpec((BB, 1, H), lambda g: (g, 0, 0)),
        compiler_params=pltpu.CompilerParams(
            dimension_semantics=("parallel",),         # megacore / v7x 2nd TC
            vmem_limit_bytes=48 * 1024 * 1024),         # resident bf16 weights
    )(x_flat, mask_flat, attn_bias, egb, wqkv, wo, w1, w2, vecs)

    return jnp.squeeze(pooled.reshape(B, H))             # .squeeze()


# ------------------------------ pure-JAX reference -----------------------------
def reference_forward(input_ids, attention_mask, params):
    """Same math as the kernel (bf16 MXU operands, f32 accumulation), plain XLA."""
    word_emb, pos_emb, type_emb, egb, wqkv, wo, w1, w2, vecs = params
    f32, bf16 = jnp.float32, jnp.bfloat16
    B, S = input_ids.shape

    x = (word_emb[input_ids] + pos_emb[:S][None, :, :]
         + type_emb[0][None, None, :]).astype(f32)
    x = _layernorm(x, egb[0:1, :], egb[1:2, :])
    mask = attention_mask.astype(f32)
    neg = (1.0 - mask)[:, None, None, :] * (-1e9)

    for l in range(L):
        vl = vecs[l]
        bq, bk, bv = vl[V_BQ, :H], vl[V_BK, :H], vl[V_BV, :H]
        bo, b1, b2 = vl[V_BO, :H], vl[V_B1, :FF], vl[V_B2, :H]
        g1, be1 = vl[V_G1:V_G1 + 1, :H], vl[V_BE1:V_BE1 + 1, :H]
        g2, be2 = vl[V_G2:V_G2 + 1, :H], vl[V_BE2:V_BE2 + 1, :H]

        qkv = jnp.einsum('bsh,hk->bsk', x.astype(bf16), wqkv[l],
                         preferred_element_type=f32)
        q = qkv[..., 0:H] + bq
        k = qkv[..., H:2 * H] + bk
        v = qkv[..., 2 * H:3 * H] + bv
        qh = q.reshape(B, S, NH, DH).transpose(0, 2, 1, 3).astype(bf16)
        kh = k.reshape(B, S, NH, DH).transpose(0, 2, 1, 3).astype(bf16)
        vh = v.reshape(B, S, NH, DH).transpose(0, 2, 1, 3).astype(bf16)
        s = jnp.einsum('bhqd,bhkd->bhqk', qh, kh, preferred_element_type=f32) + neg
        p = jax.nn.softmax(s, axis=-1)
        ctx = jnp.einsum('bhqk,bhkd->bhqd', p.astype(bf16), vh,
                         preferred_element_type=f32)
        ctx = ctx.transpose(0, 2, 1, 3).reshape(B, S, H)
        attn = jnp.einsum('bsh,hk->bsk', ctx.astype(bf16), wo[l],
                          preferred_element_type=f32) + bo
        h1 = _layernorm(attn + x, g1, be1)
        ff = jnp.einsum('bsh,hf->bsf', h1.astype(bf16), w1[l],
                        preferred_element_type=f32) + b1
        ff = jax.nn.gelu(ff, approximate=True)
        ff = jnp.einsum('bsf,fh->bsh', ff.astype(bf16), w2[l],
                        preferred_element_type=f32) + b2
        x = _layernorm(ff + h1, g2, be2)

    m = mask[:, :, None]
    pooled = (x * m).sum(1) / jnp.maximum(m.sum(1), 1e-9)
    return jnp.squeeze(pooled)


# ------------------------------- parameter init --------------------------------
def init_params(key):
    n_keys = 4 + 7 * L
    keys = jax.random.split(key, n_keys)
    ki = iter(keys)

    def nrm(shape, s=0.02):
        return s * jax.random.normal(next(ki), shape, dtype=jnp.float32)

    word_emb = nrm((VOCAB, H))
    pos_emb = nrm((MAX_POS, H))
    type_emb = nrm((2, H))

    egb_noise = jax.random.normal(next(ki), (2, H), dtype=jnp.float32)
    egb = jnp.stack([1.0 + 0.1 * egb_noise[0], 0.02 * egb_noise[1]], axis=0)

    scale = 1.0 / math.sqrt(DH)

    def pad_row(v):
        return jnp.pad(v, (0, FF - v.shape[0]))

    wqkv_l, wo_l, w1_l, w2_l, vecs_l = [], [], [], [], []
    for _ in range(L):
        wq, wk, wv, wo_ = nrm((H, H)), nrm((H, H)), nrm((H, H)), nrm((H, H))
        w1_, w2_ = nrm((H, FF)), nrm((FF, H))
        vn = jax.random.normal(next(ki), (NVEC, FF), dtype=jnp.float32)

        rows = [None] * NVEC
        rows[V_BQ] = pad_row(0.02 * vn[V_BQ, :H] * scale)   # fold 1/sqrt(DH) into bq
        rows[V_BK] = pad_row(0.02 * vn[V_BK, :H])
        rows[V_BV] = pad_row(0.02 * vn[V_BV, :H])
        rows[V_BO] = pad_row(0.02 * vn[V_BO, :H])
        rows[V_B1] = 0.02 * vn[V_B1, :FF]
        rows[V_B2] = pad_row(0.02 * vn[V_B2, :H])
        rows[V_G1] = pad_row(1.0 + 0.1 * vn[V_G1, :H])
        rows[V_BE1] = pad_row(0.02 * vn[V_BE1, :H])
        rows[V_G2] = pad_row(1.0 + 0.1 * vn[V_G2, :H])
        rows[V_BE2] = pad_row(0.02 * vn[V_BE2, :H])

        # fold attention scale into the Q block of the fused QKV weight
        wqkv_l.append(jnp.concatenate([wq * scale, wk, wv], axis=1).astype(jnp.bfloat16))
        wo_l.append(wo_.astype(jnp.bfloat16))
        w1_l.append(w1_.astype(jnp.bfloat16))
        w2_l.append(w2_.astype(jnp.bfloat16))
        vecs_l.append(jnp.stack(rows, axis=0))

    wqkv = jnp.stack(wqkv_l, axis=0)      # (L, H, 3H) bf16
    wo = jnp.stack(wo_l, axis=0)          # (L, H, H)  bf16
    w1 = jnp.stack(w1_l, axis=0)          # (L, H, FF) bf16
    w2 = jnp.stack(w2_l, axis=0)          # (L, FF, H) bf16
    vecs = jnp.stack(vecs_l, axis=0)      # (L, NVEC, FF) f32

    return (word_emb, pos_emb, type_emb, egb, wqkv, wo, w1, w2, vecs)


# ------------------------------------ main --------------------------------------
if __name__ == "__main__":
    key = jax.random.PRNGKey(0)
    k_ids, k_params = jax.random.split(key)

    B, S = 2, 16
    input_ids = jax.random.randint(k_ids, (B, S), 0, VOCAB, dtype=jnp.int32)
    attention_mask = jnp.array([[1] * S,
                                [1] * 10 + [0] * (S - 10)], dtype=jnp.int32)

    params = init_params(k_params)

    out = encoder_forward(input_ids, attention_mask, params)
    out = jax.block_until_ready(out)

    ref = reference_forward(input_ids, attention_mask, params)
    assert out.shape == (B, H), out.shape
    assert bool(jnp.all(jnp.isfinite(out)))
    assert bool(jnp.allclose(out, ref, atol=2e-3, rtol=2e-3)), \
        float(jnp.max(jnp.abs(out - ref)))
    print("KERNEL_OK")
</pallas_src>

<mosaic_0001>
module attributes {stable_mosaic.version = 11 : i64} {
  func.func @fused_encoder_kernel(%arg0: i32, %arg1: memref<32x128xf32, #tpu.memory_space<vmem>>, %arg2: memref<32x1xf32, #tpu.memory_space<vmem>>, %arg3: memref<1x32x32xf32, #tpu.memory_space<vmem>>, %arg4: memref<2x128xf32, #tpu.memory_space<vmem>>, %arg5: memref<2x128x384xbf16, #tpu.memory_space<vmem>>, %arg6: memref<2x128x128xbf16, #tpu.memory_space<vmem>>, %arg7: memref<2x128x256xbf16, #tpu.memory_space<vmem>>, %arg8: memref<2x256x128xbf16, #tpu.memory_space<vmem>>, %arg9: memref<2x10x256xf32, #tpu.memory_space<vmem>>, %arg10: memref<2x1x128xf32, #tpu.memory_space<vmem>>) attributes {dimension_semantics = [#tpu.dimension_semantics<parallel>], iteration_bounds = array<i64: 1>, scalar_prefetch = 0 : i64, scratch_operands = 0 : i64, tpu.core_type = #tpu.core_type<tc>, window_params = [{transform_indices = @transform_0, window_bounds = array<i64: 32, 128>}, {transform_indices = @transform_1, window_bounds = array<i64: 32, 1>}, {transform_indices = @transform_2, window_bounds = array<i64: 1, 32, 32>}, {pipeline_mode = #tpu.pipeline_mode<synchronous>, transform_indices = @transform_3, window_bounds = array<i64: 2, 128>}, {pipeline_mode = #tpu.pipeline_mode<synchronous>, transform_indices = @transform_4, window_bounds = array<i64: 2, 128, 384>}, {pipeline_mode = #tpu.pipeline_mode<synchronous>, transform_indices = @transform_5, window_bounds = array<i64: 2, 128, 128>}, {pipeline_mode = #tpu.pipeline_mode<synchronous>, transform_indices = @transform_6, window_bounds = array<i64: 2, 128, 256>}, {pipeline_mode = #tpu.pipeline_mode<synchronous>, transform_indices = @transform_7, window_bounds = array<i64: 2, 256, 128>}, {pipeline_mode = #tpu.pipeline_mode<synchronous>, transform_indices = @transform_8, window_bounds = array<i64: 2, 10, 256>}, {transform_indices = @transform_9, window_bounds = array<i64: 2, 1, 128>}]} {
    %c0 = arith.constant 0 : index
    %c0_0 = arith.constant 0 : index
    %0 = vector.load %arg1[%c0, %c0_0] : memref<32x128xf32, #tpu.memory_space<vmem>>, vector<32x128xf32>
    %c0_1 = arith.constant 0 : index
    %c0_2 = arith.constant 0 : index
    %1 = vector.load %arg2[%c0_1, %c0_2] : memref<32x1xf32, #tpu.memory_space<vmem>>, vector<32x1xf32>
    %c0_3 = arith.constant 0 : index
    %c0_4 = arith.constant 0 : index
    %c0_5 = arith.constant 0 : index
    %2 = vector.load %arg3[%c0_3, %c0_4, %c0_5] : memref<1x32x32xf32, #tpu.memory_space<vmem>>, vector<1x32x32xf32>
    %3 = vector.shape_cast %2 : vector<1x32x32xf32> to vector<32x32xf32>
    %c0_6 = arith.constant 0 : index
    %c0_7 = arith.constant 0 : index
    %4 = vector.load %arg4[%c0_6, %c0_7] : memref<2x128xf32, #tpu.memory_space<vmem>>, vector<2x128xf32>
    %5 = vector.extract_strided_slice %4 {offsets = [0, 0], sizes = [1, 128], strides = [1, 1]} : vector<2x128xf32> to vector<1x128xf32>
    %6 = vector.extract_strided_slice %4 {offsets = [1, 0], sizes = [1, 128], strides = [1, 1]} : vector<2x128xf32> to vector<1x128xf32>
    %cst = arith.constant dense<0.000000e+00> : vector<32xf32>
    %7 = vector.multi_reduction <add>, %0, %cst [1] : vector<32x128xf32> to vector<32xf32>
    %8 = vector.shape_cast %7 : vector<32xf32> to vector<32x1xf32>
    %cst_8 = arith.constant 1.280000e+02 : f32
    %9 = vector.broadcast %cst_8 : f32 to vector<32x1xf32>
    %10 = arith.divf %8, %9 : vector<32x1xf32>
    %11 = vector.broadcast %10 : vector<32x1xf32> to vector<32x128xf32>
    %12 = arith.subf %0, %11 : vector<32x128xf32>
    %13 = arith.mulf %12, %12 : vector<32x128xf32>
    %cst_9 = arith.constant dense<0.000000e+00> : vector<32xf32>
    %14 = vector.multi_reduction <add>, %13, %cst_9 [1] : vector<32x128xf32> to vector<32xf32>
    %15 = vector.shape_cast %14 : vector<32xf32> to vector<32x1xf32>
    %cst_10 = arith.constant 1.280000e+02 : f32
    %16 = vector.broadcast %cst_10 : f32 to vector<32x1xf32>
    %17 = arith.divf %15, %16 : vector<32x1xf32>
    %18 = vector.broadcast %10 : vector<32x1xf32> to vector<32x128xf32>
    %19 = arith.subf %0, %18 : vector<32x128xf32>
    %cst_11 = arith.constant 9.99999996E-13 : f32
    %20 = vector.broadcast %cst_11 : f32 to vector<32x1xf32>
    %21 = arith.addf %17, %20 : vector<32x1xf32>
    %22 = math.rsqrt %21 : vector<32x1xf32>
    %23 = vector.broadcast %22 : vector<32x1xf32> to vector<32x128xf32>
    %24 = arith.mulf %19, %23 : vector<32x128xf32>
    %25 = vector.broadcast %5 : vector<1x128xf32> to vector<32x128xf32>
    %26 = arith.mulf %24, %25 : vector<32x128xf32>
    %27 = vector.broadcast %6 : vector<1x128xf32> to vector<32x128xf32>
    %28 = arith.addf %26, %27 : vector<32x128xf32>
    %c0_i32 = arith.constant 0 : i32
    %c2_i32 = arith.constant 2 : i32
    %29 = arith.addi %c0_i32, %c2_i32 : i32
    %c1_i32 = arith.constant 1 : i32
    %30 = scf.for %arg11 = %c0_i32 to %29 step %c1_i32 iter_args(%arg12 = %28) -> (vector<32x128xf32>)  : i32 {
      %61 = arith.index_cast %arg11 : i32 to index
      %c0_24 = arith.constant 0 : index
      %c0_25 = arith.constant 0 : index
      %62 = vector.load %arg9[%61, %c0_24, %c0_25] : memref<2x10x256xf32, #tpu.memory_space<vmem>>, vector<1x10x256xf32>
      %63 = vector.shape_cast %62 : vector<1x10x256xf32> to vector<10x256xf32>
      %64 = vector.extract_strided_slice %63 {offsets = [0, 0], sizes = [1, 128], strides = [1, 1]} : vector<10x256xf32> to vector<1x128xf32>
      %65 = vector.extract_strided_slice %63 {offsets = [1, 0], sizes = [1, 128], strides = [1, 1]} : vector<10x256xf32> to vector<1x128xf32>
      %66 = vector.extract_strided_slice %63 {offsets = [2, 0], sizes = [1, 128], strides = [1, 1]} : vector<10x256xf32> to vector<1x128xf32>
      %67 = vector.extract_strided_slice %63 {offsets = [3, 0], sizes = [1, 128], strides = [1, 1]} : vector<10x256xf32> to vector<1x128xf32>
      %68 = vector.extract_strided_slice %63 {offsets = [4, 0], sizes = [1, 256], strides = [1, 1]} : vector<10x256xf32> to vector<1x256xf32>
      %69 = vector.extract_strided_slice %63 {offsets = [5, 0], sizes = [1, 128], strides = [1, 1]} : vector<10x256xf32> to vector<1x128xf32>
      %70 = vector.extract_strided_slice %63 {offsets = [6, 0], sizes = [1, 128], strides = [1, 1]} : vector<10x256xf32> to vector<1x128xf32>
      %71 = vector.extract_strided_slice %63 {offsets = [7, 0], sizes = [1, 128], strides = [1, 1]} : vector<10x256xf32> to vector<1x128xf32>
      %72 = vector.extract_strided_slice %63 {offsets = [8, 0], sizes = [1, 128], strides = [1, 1]} : vector<10x256xf32> to vector<1x128xf32>
      %73 = vector.extract_strided_slice %63 {offsets = [9, 0], sizes = [1, 128], strides = [1, 1]} : vector<10x256xf32> to vector<1x128xf32>
      %74 = arith.truncf %arg12 : vector<32x128xf32> to vector<32x128xbf16>
      %75 = arith.index_cast %arg11 : i32 to index
      %c0_26 = arith.constant 0 : index
      %c0_27 = arith.constant 0 : index
      %76 = vector.load %arg5[%75, %c0_26, %c0_27] : memref<2x128x384xbf16, #tpu.memory_space<vmem>>, vector<1x128x384xbf16>
      %77 = vector.shape_cast %76 : vector<1x128x384xbf16> to vector<128x384xbf16>
      %cst_28 = arith.constant dense<0.000000e+00> : vector<32x384xf32>
      %78 = tpu.matmul %74, %77, %cst_28 {dimension_numbers = #tpu.dot_dimension_numbers<[1], [0], [0], [1], [0, 0, 1, 1], [], []>} : vector<32x128xbf16>, vector<128x384xbf16>, vector<32x384xf32> -> vector<32x384xf32>
      %79 = vector.extract_strided_slice %78 {offsets = [0, 0], sizes = [32, 128], strides = [1, 1]} : vector<32x384xf32> to vector<32x128xf32>
      %80 = vector.broadcast %64 : vector<1x128xf32> to vector<32x128xf32>
      %81 = arith.addf %79, %80 : vector<32x128xf32>
      %82 = vector.extract_strided_slice %78 {offsets = [0, 128], sizes = [32, 128], strides = [1, 1]} : vector<32x384xf32> to vector<32x128xf32>
      %83 = vector.broadcast %65 : vector<1x128xf32> to vector<32x128xf32>
      %84 = arith.addf %82, %83 : vector<32x128xf32>
      %85 = vector.extract_strided_slice %78 {offsets = [0, 256], sizes = [32, 128], strides = [1, 1]} : vector<32x384xf32> to vector<32x128xf32>
      %86 = vector.broadcast %66 : vector<1x128xf32> to vector<32x128xf32>
      %87 = arith.addf %85, %86 : vector<32x128xf32>
      %88 = vector.extract_strided_slice %81 {offsets = [0, 0], sizes = [32, 32], strides = [1, 1]} : vector<32x128xf32> to vector<32x32xf32>
      %89 = vector.extract_strided_slice %81 {offsets = [0, 32], sizes = [32, 32], strides = [1, 1]} : vector<32x128xf32> to vector<32x32xf32>
      %90 = vector.extract_strided_slice %81 {offsets = [0, 64], sizes = [32, 32], strides = [1, 1]} : vector<32x128xf32> to vector<32x32xf32>
      %91 = vector.extract_strided_slice %81 {offsets = [0, 96], sizes = [32, 32], strides = [1, 1]} : vector<32x128xf32> to vector<32x32xf32>
      %92 = vector.shape_cast %88 : vector<32x32xf32> to vector<1x32x32xf32>
      %93 = vector.shape_cast %89 : vector<32x32xf32> to vector<1x32x32xf32>
      %94 = vector.shape_cast %90 : vector<32x32xf32> to vector<1x32x32xf32>
      %95 = vector.shape_cast %91 : vector<32x32xf32> to vector<1x32x32xf32>
      %96 = tpu.concatenate %92, %93, %94, %95 in 0 : vector<1x32x32xf32>, vector<1x32x32xf32>, vector<1x32x32xf32>, vector<1x32x32xf32> -> vector<4x32x32xf32>
      %97 = arith.truncf %96 : vector<4x32x32xf32> to vector<4x32x32xbf16>
      %98 = vector.extract_strided_slice %84 {offsets = [0, 0], sizes = [32, 32], strides = [1, 1]} : vector<32x128xf32> to vector<32x32xf32>
      %99 = vector.extract_strided_slice %84 {offsets = [0, 32], sizes = [32, 32], strides = [1, 1]} : vector<32x128xf32> to vector<32x32xf32>
      %100 = vector.extract_strided_slice %84 {offsets = [0, 64], sizes = [32, 32], strides = [1, 1]} : vector<32x128xf32> to vector<32x32xf32>
      %101 = vector.extract_strided_slice %84 {offsets = [0, 96], sizes = [32, 32], strides = [1, 1]} : vector<32x128xf32> to vector<32x32xf32>
      %102 = vector.shape_cast %98 : vector<32x32xf32> to vector<1x32x32xf32>
      %103 = vector.shape_cast %99 : vector<32x32xf32> to vector<1x32x32xf32>
      %104 = vector.shape_cast %100 : vector<32x32xf32> to vector<1x32x32xf32>
      %105 = vector.shape_cast %101 : vector<32x32xf32> to vector<1x32x32xf32>
      %106 = tpu.concatenate %102, %103, %104, %105 in 0 : vector<1x32x32xf32>, vector<1x32x32xf32>, vector<1x32x32xf32>, vector<1x32x32xf32> -> vector<4x32x32xf32>
      %107 = arith.truncf %106 : vector<4x32x32xf32> to vector<4x32x32xbf16>
      %108 = vector.extract_strided_slice %87 {offsets = [0, 0], sizes = [32, 32], strides = [1, 1]} : vector<32x128xf32> to vector<32x32xf32>
      %109 = vector.extract_strided_slice %87 {offsets = [0, 32], sizes = [32, 32], strides = [1, 1]} : vector<32x128xf32> to vector<32x32xf32>
      %110 = vector.extract_strided_slice %87 {offsets = [0, 64], sizes = [32, 32], strides = [1, 1]} : vector<32x128xf32> to vector<32x32xf32>
      %111 = vector.extract_strided_slice %87 {offsets = [0, 96], sizes = [32, 32], strides = [1, 1]} : vector<32x128xf32> to vector<32x32xf32>
      %112 = vector.shape_cast %108 : vector<32x32xf32> to vector<1x32x32xf32>
      %113 = vector.shape_cast %109 : vector<32x32xf32> to vector<1x32x32xf32>
      %114 = vector.shape_cast %110 : vector<32x32xf32> to vector<1x32x32xf32>
      %115 = vector.shape_cast %111 : vector<32x32xf32> to vector<1x32x32xf32>
      %116 = tpu.concatenate %112, %113, %114, %115 in 0 : vector<1x32x32xf32>, vector<1x32x32xf32>, vector<1x32x32xf32>, vector<1x32x32xf32> -> vector<4x32x32xf32>
      %117 = arith.truncf %116 : vector<4x32x32xf32> to vector<4x32x32xbf16>
      "tpu.trace_start"() <{level = 10 : i32, message = "hqd,hkd->hqk"}> : () -> ()
      %cst_29 = arith.constant dense<0.000000e+00> : vector<4x32x32xf32>
      %118 = tpu.matmul %97, %107, %cst_29 {dimension_numbers = #tpu.dot_dimension_numbers<[2], [2], [1], [1], [0, 0, 0, 1, 1, 1], [0], [0]>} : vector<4x32x32xbf16>, vector<4x32x32xbf16>, vector<4x32x32xf32> -> vector<4x32x32xf32>
      "tpu.trace_stop"() : () -> ()
      %119 = vector.shape_cast %3 : vector<32x32xf32> to vector<1x32x32xf32>
      %120 = vector.broadcast %119 : vector<1x32x32xf32> to vector<4x32x32xf32>
      %121 = arith.addf %118, %120 : vector<4x32x32xf32>
      %cst_30 = arith.constant dense<0xFF800000> : vector<4x32xf32>
      %122 = vector.multi_reduction <maximumf>, %121, %cst_30 [2] : vector<4x32x32xf32> to vector<4x32xf32>
      %123 = vector.shape_cast %122 : vector<4x32xf32> to vector<4x32x1xf32>
      %124 = vector.broadcast %123 : vector<4x32x1xf32> to vector<4x32x32xf32>
      %125 = arith.subf %121, %124 : vector<4x32x32xf32>
      %126 = math.exp %125 : vector<4x32x32xf32>
      %cst_31 = arith.constant dense<0.000000e+00> : vector<4x32xf32>
      %127 = vector.multi_reduction <add>, %126, %cst_31 [2] : vector<4x32x32xf32> to vector<4x32xf32>
      %128 = vector.shape_cast %127 : vector<4x32xf32> to vector<4x32x1xf32>
      %129 = tpu.reciprocal %128 {approx = true} : vector<4x32x1xf32> -> vector<4x32x1xf32>
      %130 = vector.broadcast %129 : vector<4x32x1xf32> to vector<4x32x32xf32>
      %131 = arith.mulf %126, %130 : vector<4x32x32xf32>
      %132 = arith.truncf %131 : vector<4x32x32xf32> to vector<4x32x32xbf16>
      "tpu.trace_start"() <{level = 10 : i32, message = "hqk,hkd->hqd"}> : () -> ()
      %cst_32 = arith.constant dense<0.000000e+00> : vector<4x32x32xf32>
      %133 = tpu.matmul %132, %117, %cst_32 {dimension_numbers = #tpu.dot_dimension_numbers<[2], [1], [1], [2], [0, 0, 0, 1, 1, 2], [0], [0]>} : vector<4x32x32xbf16>, vector<4x32x32xbf16>, vector<4x32x32xf32> -> vector<4x32x32xf32>
      "tpu.trace_stop"() : () -> ()
      %134 = vector.extract_strided_slice %133 {offsets = [0, 0, 0], sizes = [1, 32, 32], strides = [1, 1, 1]} : vector<4x32x32xf32> to vector<1x32x32xf32>
      %135 = vector.shape_cast %134 : vector<1x32x32xf32> to vector<32x32xf32>
      %136 = vector.extract_strided_slice %133 {offsets = [1, 0, 0], sizes = [1, 32, 32], strides = [1, 1, 1]} : vector<4x32x32xf32> to vector<1x32x32xf32>
      %137 = vector.shape_cast %136 : vector<1x32x32xf32> to vector<32x32xf32>
      %138 = vector.extract_strided_slice %133 {offsets = [2, 0, 0], sizes = [1, 32, 32], strides = [1, 1, 1]} : vector<4x32x32xf32> to vector<1x32x32xf32>
      %139 = vector.shape_cast %138 : vector<1x32x32xf32> to vector<32x32xf32>
      %140 = vector.extract_strided_slice %133 {offsets = [3, 0, 0], sizes = [1, 32, 32], strides = [1, 1, 1]} : vector<4x32x32xf32> to vector<1x32x32xf32>
      %141 = vector.shape_cast %140 : vector<1x32x32xf32> to vector<32x32xf32>
      %142 = tpu.concatenate %135, %137, %139, %141 in 1 : vector<32x32xf32>, vector<32x32xf32>, vector<32x32xf32>, vector<32x32xf32> -> vector<32x128xf32>
      %143 = arith.truncf %142 : vector<32x128xf32> to vector<32x128xbf16>
      %144 = arith.index_cast %arg11 : i32 to index
      %c0_33 = arith.constant 0 : index
      %c0_34 = arith.constant 0 : index
      %145 = vector.load %arg6[%144, %c0_33, %c0_34] : memref<2x128x128xbf16, #tpu.memory_space<vmem>>, vector<1x128x128xbf16>
      %146 = vector.shape_cast %145 : vector<1x128x128xbf16> to vector<128x128xbf16>
      %cst_35 = arith.constant dense<0.000000e+00> : vector<32x128xf32>
      %147 = tpu.matmul %143, %146, %cst_35 {dimension_numbers = #tpu.dot_dimension_numbers<[1], [0], [0], [1], [0, 0, 1, 1], [], []>} : vector<32x128xbf16>, vector<128x128xbf16>, vector<32x128xf32> -> vector<32x128xf32>
      %148 = vector.broadcast %67 : vector<1x128xf32> to vector<32x128xf32>
      %149 = arith.addf %147, %148 : vector<32x128xf32>
      %150 = arith.addf %149, %arg12 : vector<32x128xf32>
      %cst_36 = arith.constant dense<0.000000e+00> : vector<32xf32>
      %151 = vector.multi_reduction <add>, %150, %cst_36 [1] : vector<32x128xf32> to vector<32xf32>
      %152 = vector.shape_cast %151 : vector<32xf32> to vector<32x1xf32>
      %cst_37 = arith.constant 1.280000e+02 : f32
      %153 = vector.broadcast %cst_37 : f32 to vector<32x1xf32>
      %154 = arith.divf %152, %153 : vector<32x1xf32>
      %155 = vector.broadcast %154 : vector<32x1xf32> to vector<32x128xf32>
      %156 = arith.subf %150, %155 : vector<32x128xf32>
      %157 = arith.mulf %156, %156 : vector<32x128xf32>
      %cst_38 = arith.constant dense<0.000000e+00> : vector<32xf32>
      %158 = vector.multi_reduction <add>, %157, %cst_38 [1] : vector<32x128xf32> to vector<32xf32>
      %159 = vector.shape_cast %158 : vector<32xf32> to vector<32x1xf32>
      %cst_39 = arith.constant 1.280000e+02 : f32
      %160 = vector.broadcast %cst_39 : f32 to vector<32x1xf32>
      %161 = arith.divf %159, %160 : vector<32x1xf32>
      %162 = vector.broadcast %154 : vector<32x1xf32> to vector<32x128xf32>
      %163 = arith.subf %150, %162 : vector<32x128xf32>
      %cst_40 = arith.constant 9.99999996E-13 : f32
      %164 = vector.broadcast %cst_40 : f32 to vector<32x1xf32>
      %165 = arith.addf %161, %164 : vector<32x1xf32>
      %166 = math.rsqrt %165 : vector<32x1xf32>
      %167 = vector.broadcast %166 : vector<32x1xf32> to vector<32x128xf32>
      %168 = arith.mulf %163, %167 : vector<32x128xf32>
      %169 = vector.broadcast %70 : vector<1x128xf32> to vector<32x128xf32>
      %170 = arith.mulf %168, %169 : vector<32x128xf32>
      %171 = vector.broadcast %71 : vector<1x128xf32> to vector<32x128xf32>
      %172 = arith.addf %170, %171 : vector<32x128xf32>
      %173 = arith.truncf %172 : vector<32x128xf32> to vector<32x128xbf16>
      %174 = arith.index_cast %arg11 : i32 to index
      %c0_41 = arith.constant 0 : index
      %c0_42 = arith.constant 0 : index
      %175 = vector.load %arg7[%174, %c0_41, %c0_42] : memref<2x128x256xbf16, #tpu.memory_space<vmem>>, vector<1x128x256xbf16>
      %176 = vector.shape_cast %175 : vector<1x128x256xbf16> to vector<128x256xbf16>
      %cst_43 = arith.constant dense<0.000000e+00> : vector<32x256xf32>
      %177 = tpu.matmul %173, %176, %cst_43 {dimension_numbers = #tpu.dot_dimension_numbers<[1], [0], [0], [1], [0, 0, 1, 1], [], []>} : vector<32x128xbf16>, vector<128x256xbf16>, vector<32x256xf32> -> vector<32x256xf32>
      %178 = vector.broadcast %68 : vector<1x256xf32> to vector<32x256xf32>
      %179 = arith.addf %177, %178 : vector<32x256xf32>
      %180 = arith.mulf %179, %179 : vector<32x256xf32>
      %181 = arith.mulf %179, %180 : vector<32x256xf32>
      %cst_44 = arith.constant 4.471500e-02 : f32
      %182 = vector.broadcast %cst_44 : f32 to vector<32x256xf32>
      %183 = arith.mulf %182, %181 : vector<32x256xf32>
      %184 = arith.addf %179, %183 : vector<32x256xf32>
      %cst_45 = arith.constant 0.797884583 : f32
      %185 = vector.broadcast %cst_45 : f32 to vector<32x256xf32>
      %186 = arith.mulf %185, %184 : vector<32x256xf32>
      %187 = math.tanh %186 : vector<32x256xf32>
      %cst_46 = arith.constant 1.000000e+00 : f32
      %188 = vector.broadcast %cst_46 : f32 to vector<32x256xf32>
      %189 = arith.addf %188, %187 : vector<32x256xf32>
      %cst_47 = arith.constant 5.000000e-01 : f32
      %190 = vector.broadcast %cst_47 : f32 to vector<32x256xf32>
      %191 = arith.mulf %190, %189 : vector<32x256xf32>
      %192 = arith.mulf %179, %191 : vector<32x256xf32>
      %193 = arith.truncf %192 : vector<32x256xf32> to vector<32x256xbf16>
      %194 = arith.index_cast %arg11 : i32 to index
      %c0_48 = arith.constant 0 : index
      %c0_49 = arith.constant 0 : index
      %195 = vector.load %arg8[%194, %c0_48, %c0_49] : memref<2x256x128xbf16, #tpu.memory_space<vmem>>, vector<1x256x128xbf16>
      %196 = vector.shape_cast %195 : vector<1x256x128xbf16> to vector<256x128xbf16>
      %cst_50 = arith.constant dense<0.000000e+00> : vector<32x128xf32>
      %197 = tpu.matmul %193, %196, %cst_50 {dimension_numbers = #tpu.dot_dimension_numbers<[1], [0], [0], [1], [0, 0, 1, 1], [], []>} : vector<32x256xbf16>, vector<256x128xbf16>, vector<32x128xf32> -> vector<32x128xf32>
      %198 = vector.broadcast %69 : vector<1x128xf32> to vector<32x128xf32>
      %199 = arith.addf %197, %198 : vector<32x128xf32>
      %200 = arith.addf %199, %172 : vector<32x128xf32>
      %cst_51 = arith.constant dense<0.000000e+00> : vector<32xf32>
      %201 = vector.multi_reduction <add>, %200, %cst_51 [1] : vector<32x128xf32> to vector<32xf32>
      %202 = vector.shape_cast %201 : vector<32xf32> to vector<32x1xf32>
      %cst_52 = arith.constant 1.280000e+02 : f32
      %203 = vector.broadcast %cst_52 : f32 to vector<32x1xf32>
      %204 = arith.divf %202, %203 : vector<32x1xf32>
      %205 = vector.broadcast %204 : vector<32x1xf32> to vector<32x128xf32>
      %206 = arith.subf %200, %205 : vector<32x128xf32>
      %207 = arith.mulf %206, %206 : vector<32x128xf32>
      %cst_53 = arith.constant dense<0.000000e+00> : vector<32xf32>
      %208 = vector.multi_reduction <add>, %207, %cst_53 [1] : vector<32x128xf32> to vector<32xf32>
      %209 = vector.shape_cast %208 : vector<32xf32> to vector<32x1xf32>
      %cst_54 = arith.constant 1.280000e+02 : f32
      %210 = vector.broadcast %cst_54 : f32 to vector<32x1xf32>
      %211 = arith.divf %209, %210 : vector<32x1xf32>
      %212 = vector.broadcast %204 : vector<32x1xf32> to vector<32x128xf32>
      %213 = arith.subf %200, %212 : vector<32x128xf32>
      %cst_55 = arith.constant 9.99999996E-13 : f32
      %214 = vector.broadcast %cst_55 : f32 to vector<32x1xf32>
      %215 = arith.addf %211, %214 : vector<32x1xf32>
      %216 = math.rsqrt %215 : vector<32x1xf32>
      %217 = vector.broadcast %216 : vector<32x1xf32> to vector<32x128xf32>
      %218 = arith.mulf %213, %217 : vector<32x128xf32>
      %219 = vector.broadcast %72 : vector<1x128xf32> to vector<32x128xf32>
      %220 = arith.mulf %218, %219 : vector<32x128xf32>
      %221 = vector.broadcast %73 : vector<1x128xf32> to vector<32x128xf32>
      %222 = arith.addf %220, %221 : vector<32x128xf32>
      scf.yield %222 : vector<32x128xf32>
    }
    %c2_i32_12 = arith.constant 2 : i32
    %31 = vector.broadcast %1 : vector<32x1xf32> to vector<32x128xf32>
    %32 = arith.mulf %30, %31 : vector<32x128xf32>
    %33 = vector.extract_strided_slice %32 {offsets = [0, 0], sizes = [16, 128], strides = [1, 1]} : vector<32x128xf32> to vector<16x128xf32>
    %34 = vector.extract_strided_slice %1 {offsets = [0, 0], sizes = [16, 1], strides = [1, 1]} : vector<32x1xf32> to vector<16x1xf32>
    %35 = vector.shape_cast %34 : vector<16x1xf32> to vector<1x16x1xf32>
    %cst_13 = arith.constant dense<0.000000e+00> : vector<1xf32>
    %36 = vector.multi_reduction <add>, %35, %cst_13 [1, 2] : vector<1x16x1xf32> to vector<1xf32>
    %37 = vector.shape_cast %36 : vector<1xf32> to vector<1x1x1xf32>
    %38 = vector.extract %37[0, 0, 0] : f32 from vector<1x1x1xf32>
    %cst_14 = arith.constant 9.99999971E-10 : f32
    %39 = arith.maximumf %38, %cst_14 : f32
    %cst_15 = arith.constant dense<0.000000e+00> : vector<128xf32>
    %40 = vector.multi_reduction <add>, %33, %cst_15 [0] : vector<16x128xf32> to vector<128xf32>
    %41 = vector.shape_cast %40 : vector<128xf32> to vector<1x128xf32>
    %42 = vector.broadcast %39 : f32 to vector<1x128xf32>
    %43 = arith.divf %41, %42 : vector<1x128xf32>
    %c0_16 = arith.constant 0 : index
    %c0_17 = arith.constant 0 : index
    %c0_18 = arith.constant 0 : index
    %44 = vector.load %arg10[%c0_16, %c0_17, %c0_18] : memref<2x1x128xf32, #tpu.memory_space<vmem>>, vector<1x1x128xf32>
    %45 = vector.shape_cast %44 : vector<1x1x128xf32> to vector<1x128xf32>
    %46 = vector.shape_cast %43 : vector<1x128xf32> to vector<1x1x128xf32>
    tpu.vector_store %arg10[%c0_16, %c0_17, %c0_18], %46 {strides = array<i32>} : memref<2x1x128xf32, #tpu.memory_space<vmem>>, vector<1x1x128xf32>,
    %47 = vector.extract_strided_slice %32 {offsets = [16, 0], sizes = [16, 128], strides = [1, 1]} : vector<32x128xf32> to vector<16x128xf32>
    %48 = vector.extract_strided_slice %1 {offsets = [16, 0], sizes = [16, 1], strides = [1, 1]} : vector<32x1xf32> to vector<16x1xf32>
    %49 = vector.shape_cast %48 : vector<16x1xf32> to vector<1x16x1xf32>
    %cst_19 = arith.constant dense<0.000000e+00> : vector<1xf32>
    %50 = vector.multi_reduction <add>, %49, %cst_19 [1, 2] : vector<1x16x1xf32> to vector<1xf32>
    %51 = vector.shape_cast %50 : vector<1xf32> to vector<1x1x1xf32>
    %52 = vector.extract %51[0, 0, 0] : f32 from vector<1x1x1xf32>
    %cst_20 = arith.constant 9.99999971E-10 : f32
    %53 = arith.maximumf %52, %cst_20 : f32
    %cst_21 = arith.constant dense<0.000000e+00> : vector<128xf32>
    %54 = vector.multi_reduction <add>, %47, %cst_21 [0] : vector<16x128xf32> to vector<128xf32>
    %55 = vector.shape_cast %54 : vector<128xf32> to vector<1x128xf32>
    %56 = vector.broadcast %53 : f32 to vector<1x128xf32>
    %57 = arith.divf %55, %56 : vector<1x128xf32>
    %c1 = arith.constant 1 : index
    %c0_22 = arith.constant 0 : index
    %c0_23 = arith.constant 0 : index
    %58 = vector.load %arg10[%c1, %c0_22, %c0_23] : memref<2x1x128xf32, #tpu.memory_space<vmem>>, vector<1x1x128xf32>
    %59 = vector.shape_cast %58 : vector<1x1x128xf32> to vector<1x128xf32>
    %60 = vector.shape_cast %57 : vector<1x128xf32> to vector<1x1x128xf32>
    tpu.vector_store %arg10[%c1, %c0_22, %c0_23], %60 {strides = array<i32>} : memref<2x1x128xf32, #tpu.memory_space<vmem>>, vector<1x1x128xf32>,
    return
  }
  func.func @transform_0(%arg0: i32) -> (i32, i32) {
    %c0_i32 = arith.constant 0 : i32
    %c0_i32_0 = arith.constant 0 : i32
    return %arg0, %c0_i32 : i32, i32
  }
  func.func @transform_1(%arg0: i32) -> (i32, i32) {
    %c0_i32 = arith.constant 0 : i32
    %c0_i32_0 = arith.constant 0 : i32
    return %arg0, %c0_i32 : i32, i32
  }
  func.func @transform_2(%arg0: i32) -> (i32, i32, i32) {
    %c0_i32 = arith.constant 0 : i32
    %c0_i32_0 = arith.constant 0 : i32
    %c0_i32_1 = arith.constant 0 : i32
    return %arg0, %c0_i32, %c0_i32_0 : i32, i32, i32
  }
  func.func @transform_3(%arg0: i32) -> (i32, i32) {
    %c0_i32 = arith.constant 0 : i32
    %c0_i32_0 = arith.constant 0 : i32
    %c0_i32_1 = arith.constant 0 : i32
    return %c0_i32, %c0_i32_0 : i32, i32
  }
  func.func @transform_4(%arg0: i32) -> (i32, i32, i32) {
    %c0_i32 = arith.constant 0 : i32
    %c0_i32_0 = arith.constant 0 : i32
    %c0_i32_1 = arith.constant 0 : i32
    %c0_i32_2 = arith.constant 0 : i32
    return %c0_i32, %c0_i32_0, %c0_i32_1 : i32, i32, i32
  }
  func.func @transform_5(%arg0: i32) -> (i32, i32, i32) {
    %c0_i32 = arith.constant 0 : i32
    %c0_i32_0 = arith.constant 0 : i32
    %c0_i32_1 = arith.constant 0 : i32
    %c0_i32_2 = arith.constant 0 : i32
    return %c0_i32, %c0_i32_0, %c0_i32_1 : i32, i32, i32
  }
  func.func @transform_6(%arg0: i32) -> (i32, i32, i32) {
    %c0_i32 = arith.constant 0 : i32
    %c0_i32_0 = arith.constant 0 : i32
    %c0_i32_1 = arith.constant 0 : i32
    %c0_i32_2 = arith.constant 0 : i32
    return %c0_i32, %c0_i32_0, %c0_i32_1 : i32, i32, i32
  }
  func.func @transform_7(%arg0: i32) -> (i32, i32, i32) {
    %c0_i32 = arith.constant 0 : i32
    %c0_i32_0 = arith.constant 0 : i32
    %c0_i32_1 = arith.constant 0 : i32
    %c0_i32_2 = arith.constant 0 : i32
    return %c0_i32, %c0_i32_0, %c0_i32_1 : i32, i32, i32
  }
  func.func @transform_8(%arg0: i32) -> (i32, i32, i32) {
    %c0_i32 = arith.constant 0 : i32
    %c0_i32_0 = arith.constant 0 : i32
    %c0_i32_1 = arith.constant 0 : i32
    %c0_i32_2 = arith.constant 0 : i32
    return %c0_i32, %c0_i32_0, %c0_i32_1 : i32, i32, i32
  }
  func.func @transform_9(%arg0: i32) -> (i32, i32, i32) {
    %c0_i32 = arith.constant 0 : i32
    %c0_i32_0 = arith.constant 0 : i32
    %c0_i32_1 = arith.constant 0 : i32
    return %arg0, %c0_i32, %c0_i32_0 : i32, i32, i32
  }
}

</mosaic_0001>

<bundles_post_ra>
// kernel: encoder_forward.1
= control target key start
LH: loop header
LB: loop body
LE: loop exit
PB: predicated region body
PF: predicated region fallthrough
CT: control target
= control target key end

     0   :  { %14 = vsyncpa [#allocation3], 0  ;;  %s3524_s0 = inlined_call_operand.vmem [shape: f32[32,128], index: 0, kind: input, shape index: {}]   ;;  %s3525_s1 = inlined_call_operand.vmem [shape: f32[32,1], index: 1, kind: input, shape index: {}]   ;;  %s3526_s2 = inlined_call_operand.vmem [shape: f32[1,32,32], index: 2, kind: input, shape index: {}]   ;;  %s3527_s3 = inlined_call_operand.vmem [shape: f32[2,128], index: 3, kind: input, shape index: {}]   ;;  %s3528_s4 = inlined_call_operand.vmem [shape: bf16[2,128,384], index: 4, kind: input, shape index: {}]   ;;  %s3529_s5 = inlined_call_operand.hbm [shape: bf16[2,128,128], index: 5, kind: input, shape index: {}]   ;;  %s3530_s6 = inlined_call_operand.vmem [shape: bf16[2,128,256], index: 6, kind: input, shape index: {}]   ;;  %s3531_s7 = inlined_call_operand.hbm [shape: bf16[2,256,128], index: 7, kind: input, shape index: {}]   ;;  %s3532_s8 = inlined_call_operand.vmem [shape: f32[2,10,256], index: 8, kind: input, shape index: {}]   ;;  %s3533_s9 = inlined_call_operand.hbm [shape: f32[2,1,128], index: 9, kind: output, shape index: {}]  }
   0x1   :  { %15 = vsyncpa [#allocation6], 0 }
   0x2   :  { %16 = vsyncpa [#allocation4], 0  ;;  %s2853_s30 = smov [#allocation2]   ;;  %s2741_s13 = scalar_lea.hbm %s3529_s5, 2048 }
   0x3   :  { %s32_s10 = sshll.u32 %s2853_s30, 4  ;;  %p2742_p0 = scmp.ne.s32.totalorder %s3529_s5, %s2741_s13  ;;  %s33_s10 = int_to_ptr.vmem [resolvable:$true] %s32_s10 }
   0x4   :  { %p2745_p1 = scmp.lt.u32.totalorder %s2741_s13, %s3529_s5 }
   0x6   :  { %p2747_p2 = pnand %p2745_p1, %p2742_p0 }
   0x8   :  { %2750 = shalt.err (!%p2747_p2)
}
   0x9   :  { %s2751_s18 = scalar_lea.vmem %s33_s10, 2048  ;;  %p2756_p4 = scmp.lt.s32.totalorder %s33_s10, %s33_s10 }
   0xa   :  { %p2752_p3 = scmp.ne.s32.totalorder %s33_s10, %s2751_s18  ;;  %p2757_p5 = scmp.lt.s32.totalorder %s2751_s18, %s2751_s18 }
   0xc   :  { %p2758_p6 = por %p2757_p5, %p2756_p4 }
   0xe   :  { %p2759_p7 = pnand %p2758_p6, %p2752_p3 }
  0x10   :  { %2762 = shalt.err (!%p2759_p7)
}
  0x11   :  { %s2854_s19 = smov 64   ;;  %s2855_s20 = smov 4  }
  0x12   :  { %38 = dma.hbm_to_vmem [thread:$0]  %s3529_s5, 2048, %s33_s10, [#allocation3], %s2854_s19, %s2854_s19, %s2855_s20  }
  0x13   :  { %s2856_s23 = smov [#allocation5]   ;;  %s2763_s27 = scalar_lea.hbm %s3531_s7, 4096 }
  0x14   :  { %s46_s24 = sshll.u32 %s2856_s23, 4  ;;  %p2764_p8 = scmp.ne.s32.totalorder %s3531_s7, %s2763_s27  ;;  %s47_s24 = int_to_ptr.vmem [resolvable:$true] %s46_s24 }
  0x15   :  { %p2767_p9 = scmp.lt.u32.totalorder %s2763_s27, %s3531_s7 }
  0x17   :  { %p2769_p10 = pnand %p2767_p9, %p2764_p8 }
  0x19   :  { %2772 = shalt.err (!%p2769_p10)
}
  0x1a   :  { %s2773_s12 = scalar_lea.vmem %s47_s24, 4096  ;;  %p2778_p12 = scmp.lt.s32.totalorder %s47_s24, %s47_s24 }
  0x1b   :  { %p2774_p11 = scmp.ne.s32.totalorder %s47_s24, %s2773_s12  ;;  %p2779_p13 = scmp.lt.s32.totalorder %s2773_s12, %s2773_s12 }
  0x1d   :  { %p2780_p0 = por %p2779_p13, %p2778_p12 }
  0x1f   :  { %p2781_p1 = pnand %p2780_p0, %p2774_p11 }
  0x21   :  { %2784 = shalt.err (!%p2781_p1)
}
  0x22   :  { %52 = dma.hbm_to_vmem [thread:$0]  %s3531_s7, 4096, %s47_s24, [#allocation6], %s2854_s19, %s2854_s19, %s2855_s20  }
  0x23   :  { %2827 = dma.done.wait [#allocation3], 2048  }
  0x24   :  { %2828 = vsyncadd [#allocation3], 4294965248 }
  0x25   :  { %2829 = dma.done.wait [#allocation6], 4096  }
  0x26   :  { %2830 = vsyncadd [#allocation6], 4294963200  ;;  %v2943_v0 = vld [vmem:[%s3525_s1] sm:$0xff]  ;;  %v2948_v1 = vld [vmem:[%s3525_s1 + $0x8] sm:$0xff]  ;;  %v120_v30 = vlaneseq }
  0x27   :  { %v2953_v2 = vld [vmem:[%s3525_s1 + $0x10] sm:$0xff]  ;;  %v2958_v3 = vld [vmem:[%s3525_s1 + $0x18] sm:$0xff]  ;;  %v2963_v4 = vld [vmem:[%s3526_s2] sm:$0xff] }
  0x28   :  { %v2968_v5 = vld [vmem:[%s3526_s2 + $0x8] sm:$0xff]  ;;  %v2973_v6 = vld [vmem:[%s3526_s2 + $0x10] sm:$0xff]  ;;  %v2978_v7 = vld [vmem:[%s3526_s2 + $0x18] sm:$0xff]  ;;  %v2992_v36 = vshrl.u32 %v120_v30, 7 }
  0x29   :  { %v62_v8 = vld [vmem:[%s3524_s0] sm:$0xff]  ;;  %v64_v9 = vld [vmem:[%s3524_s0 + $0x10] sm:$0xff]  ;;  %v63_v10 = vld [vmem:[%s3524_s0 + $0x8] sm:$0xff] }
  0x2a   :  { %75 = vadd.xlane.f32.xlu0 %v62_v8  ;;  %79 = vadd.xlane.f32.xlu1 %v64_v9  ;;  %v65_v11 = vld [vmem:[%s3524_s0 + $0x18] sm:$0xff]  ;;  %v2995_v41 = vsub.s32 0, %v2992_v36  ;;  %v74_v42 = vld [vmem:[%s3527_s3] sm:$0x3]  ;;  %v3001_v44 = vsub.s32 1, %v2992_v36  ;;  %s3013_s3 = smov 0  }
  0x2c   :  { %v123_v45 = vrot.slane %v74_v42, %v2995_v41  ;;  %v131_v47 = vrot.slane %v74_v42, %v3001_v44 }
  0x2e   :  { %77 = vadd.xlane.f32.xlu0 %v63_v10  ;;  %81 = vadd.xlane.f32.xlu1 %v65_v11 }
  0xb7   :  { %v76_v12 = vpop.xlane.xlu0 %75  ;;  %v80_v14 = vpop.xlane.xlu1 %79 }
  0xb8   :  { %v84_v13 = vmul.f32 0.0078125, %v76_v12  ;;  %v86_v15 = vmul.f32 0.0078125, %v80_v14 }
  0xba   :  { %v88_v16 = vsub.f32 %v62_v8, %v84_v13  ;;  %v90_v17 = vsub.f32 %v64_v9, %v86_v15 }
  0xbb   :  { %v78_v18 = vpop.xlane.xlu0 %77  ;;  %v82_v21 = vpop.xlane.xlu1 %81 }
  0xbc   :  { %v85_v19 = vmul.f32 0.0078125, %v78_v18  ;;  %v92_v20 = vmul.f32 %v88_v16, %v88_v16  ;;  %v87_v22 = vmul.f32 0.0078125, %v82_v21  ;;  %v94_v24 = vmul.f32 %v90_v17, %v90_v17 }
  0xbe   :  { %v89_v23 = vsub.f32 %v63_v10, %v85_v19  ;;  %96 = vadd.xlane.f32.xlu0 %v92_v20  ;;  %v91_v25 = vsub.f32 %v65_v11, %v87_v22 }
  0xc0   :  { %v93_v26 = vmul.f32 %v89_v23, %v89_v23  ;;  %v95_v27 = vmul.f32 %v91_v25, %v91_v25 }
  0xc2   :  { %100 = vadd.xlane.f32.xlu0 %v94_v24  ;;  %98 = vadd.xlane.f32.xlu1 %v93_v26 }
  0xc6   :  { %102 = vadd.xlane.f32.xlu1 %v95_v27 }
 0x14b   :  { %v97_v28 = vpop.xlane.xlu0 %96 }
 0x14c   :  { %v104_v29 = vmul.f32 0.0078125, %v97_v28 }
 0x14e   :  { %v108_v31 = vadd.f32 1e-12, %v104_v29 }
 0x14f   :  { %v99_v32 = vpop.xlane.xlu1 %98  ;;  %v101_v33 = vpop.xlane.xlu0 %100 }
 0x150   :  { %2430 = vrsqrt.f32 %v108_v31  ;;  %v105_v34 = vmul.f32 0.0078125, %v99_v32  ;;  %v106_v35 = vmul.f32 0.0078125, %v101_v33 }
 0x152   :  { %v109_v37 = vadd.f32 1e-12, %v105_v34  ;;  %v110_v38 = vadd.f32 1e-12, %v106_v35 }
 0x153   :  { %v103_v39 = vpop.xlane.xlu1 %102 }
 0x154   :  { %2432 = vrsqrt.f32 %v109_v37  ;;  %v107_v40 = vmul.f32 0.0078125, %v103_v39 }
 0x155   :  { %2434 = vrsqrt.f32 %v110_v38 }
 0x156   :  { %v111_v43 = vadd.f32 1e-12, %v107_v40 }
 0x158   :  { %2436 = vrsqrt.f32 %v111_v43 }
 0x15a   :  { %v2431_v46 = vpop.eup %2430 }
 0x15b   :  { %v116_v48 = vmul.f32 %v2431_v46, %v88_v16 }
 0x15d   :  { %v124_v49 = vmul.f32 %v123_v45, %v116_v48 }
 0x15e   :  { %v2433_v50 = vpop.eup %2432 }
 0x15f   :  { %v2435_v51 = vpop.eup %2434  ;;  %v132_v52 = vadd.f32 %v131_v47, %v124_v49   ;;  %v117_v53 = vmul.f32 %v2433_v50, %v89_v23 }
 0x160   :  { %v118_v54 = vmul.f32 %v2435_v51, %v90_v17 }
 0x161   :  { %v125_v55 = vmul.f32 %v123_v45, %v117_v53 }
 0x162   :  { %v2437_v56 = vpop.eup %2436  ;;  %v126_v57 = vmul.f32 %v123_v45, %v118_v54 }
 0x163   :  { %v133_v58 = vadd.f32 %v131_v47, %v125_v55   ;;  %v119_v59 = vmul.f32 %v2437_v56, %v91_v25 }
 0x164   :  { %v134_v60 = vadd.f32 %v131_v47, %v126_v57  }
 0x165   :  { %v127_v61 = vmul.f32 %v123_v45, %v119_v59 }
 0x167   :  { %v135_v62 = vadd.f32 %v131_v47, %v127_v61  }
 0x168 LB: > { %v2857_v63 = vmov 0   ;;  %s2177_s13 = smul.u32 192, %s2851_s3  ;;  %v152_v8 = vpack.c.bf16 %v2843_v58, %v2847_v52  ;;  %v153_v33 = vpack.c.bf16 %v2835_v62, %v2839_v60  ;;  %s2176_s17 = sshll.u32 %s2851_s3, 5  ;;  %vm587_vm0 = vcmask 261120   ;;  %s2851_s3 = sphi %s3013_s3, %s141_s3   ;;  %v2847_v52 = vphi %v132_v52, %v3537_v52   ;;  %v2843_v58 = vphi %v133_v58, %v3536_v58   ;;  %v2839_v60 = vphi %v134_v60, %v3535_v60   ;;  %v2835_v62 = vphi %v135_v62, %v3534_v62  }
 0x169   : > { %349 = vmatprep.mubr.bf16.mxu0 %v2857_v63  ;;  %s3070_s19 = scalar_lea.vmem %s3532_s8, %s2176_s17  ;;  %s2858_s20 = smov 64   ;;  %vm1288_vm1 = vcmask 523264   ;;  %vm1293_vm2 = vcmask 785408  }
 0x16a   : > { %s3037_s16 = scalar_lea.vmem %s3528_s4, %s2177_s13  ;;  %2277 = vmatprep.mubr.bf16.mxu1 %v152_v8  ;;  %v149_v34 = vld [vmem:[%s3070_s19] sm:$0xff]  ;;  %s2859_s21 = smov 96  }
 0x16b   : > { %v2558_v9 = vld [vmem:[%s3037_s16 + $0x4] ss:$12 sps:$4 sm:$0xff]   ;;  %v2560_v10 = vld [vmem:[%s3037_s16] ss:$12 sps:$4 sm:$0xff]   ;;  %v2561_v11 = vld [vmem:[%s3037_s16 + $0x1c] ss:$12 sps:$4 sm:$0xff]   ;;  %v422_v35 = vrot.slane %v149_v34, %v2995_v41  ;;  %v430_v38 = vrot.slane %v149_v34, %v3001_v44 }
 0x16c   : > { %317 = vmatprep.subr.bf16.mxu0 %v2558_v9  ;;  %v2563_v12 = vld [vmem:[%s3037_s16 + $0x18] ss:$12 sps:$4 sm:$0xff]   ;;  %v2564_v13 = vld [vmem:[%s3037_s16 + $0x34] ss:$12 sps:$4 sm:$0xff]   ;;  %v2566_v14 = vld [vmem:[%s3037_s16 + $0x30] ss:$12 sps:$4 sm:$0xff]  }
 0x16d   : > { %318 = vmatpush1.bf16.msra.mxu0 %v2560_v10  ;;  %v2567_v15 = vld [vmem:[%s3037_s16 + $0x4c] ss:$12 sps:$4 sm:$0xff]   ;;  %v2569_v16 = vld [vmem:[%s3037_s16 + $0x48] ss:$12 sps:$4 sm:$0xff]   ;;  %v2570_v17 = vld [vmem:[%s3037_s16 + $0x64] ss:$12 sps:$4 sm:$0xff]  }
 0x16e   : > { %319 = vmatprep.subr.bf16.mxu0 %v2561_v11  ;;  %v2582_v18 = vld [vmem:[%s3037_s16 + $0x8] ss:$12 sps:$4 sm:$0xff]   ;;  %v2583_v19 = vld [vmem:[%s3037_s16 + $0x20] ss:$12 sps:$4 sm:$0xff]   ;;  %v2584_v21 = vld [vmem:[%s3037_s16 + $0x38] ss:$12 sps:$4 sm:$0xff]  }
 0x16f   : > { %2261 = vmatprep.subr.bf16.mxu1 %v2582_v18  ;;  %v2572_v20 = vld [vmem:[%s3037_s16 + $0x60] ss:$12 sps:$4 sm:$0xff]   ;;  %v2573_v22 = vld [vmem:[%s3037_s16 + $0x7c] ss:$12 sps:$4 sm:$0xff]   ;;  %v2575_v23 = vld [vmem:[%s3037_s16 + $0x78] ss:$12 sps:$4 sm:$0xff]  }
 0x170   : > { %2262 = vmatpush3.bf16.msra.mxu1 %v2582_v18  ;;  %v2585_v24 = vld [vmem:[%s3037_s16 + $0x50] ss:$12 sps:$4 sm:$0xff]   ;;  %v2576_v25 = vld [vmem:[%s3037_s16 + $0x94] ss:$12 sps:$4 sm:$0xff]   ;;  %v2579_v28 = vld [vmem:[%s3037_s16 + $0xac] ss:$12 sps:$4 sm:$0xff]  }
 0x171   : > { %320 = vmatpush1.bf16.msra.mxu0 %v2563_v12  ;;  %2263 = vmatprep.subr.bf16.mxu1 %v2583_v19  ;;  %v2578_v26 = vld [vmem:[%s3037_s16 + $0x90] ss:$12 sps:$4 sm:$0xff]   ;;  %v2586_v27 = vld [vmem:[%s3037_s16 + $0x68] ss:$12 sps:$4 sm:$0xff]   ;;  %v2587_v30 = vld [vmem:[%s3037_s16 + $0x80] ss:$12 sps:$4 sm:$0xff]  }
 0x172   : > { %321 = vmatprep.subr.bf16.mxu0 %v2564_v13  ;;  %v2581_v29 = vld [vmem:[%s3037_s16 + $0xa8] ss:$12 sps:$4 sm:$0xff]   ;;  %v2588_v31 = vld [vmem:[%s3037_s16 + $0x98] ss:$12 sps:$4 sm:$0xff]   ;;  %v2589_v32 = vld [vmem:[%s3037_s16 + $0xb0] ss:$12 sps:$4 sm:$0xff]  }
 0x173   : > { %s2860_s22 = smov 32   ;;  %s2178_s23 = sshll.u32 %s2851_s3, 6 }
 0x174   : > { %2264 = vmatpush3.bf16.msra.mxu1 %v2583_v19  ;;  %s3326_s24 = scalar_lea.vmem [#allocation2], %s2178_s23  ;;  %s2179_s25 = sshll.u32 %s2851_s3, 7 }
 0x175   : > { %322 = vmatpush1.bf16.msra.mxu0 %v2566_v14  ;;  %2265 = vmatprep.subr.bf16.mxu1 %v2584_v21  ;;  %s3367_s1 = scalar_lea.vmem %s3530_s6, %s2179_s25  ;;  %s3373_s28 = scalar_lea.vmem [#allocation5], %s2179_s25 }
 0x176   : > { %323 = vmatprep.subr.bf16.mxu0 %v2567_v15  ;;  %s141_s3 = sadd.s32 1, %s2851_s3  }
 0x177   : > { %p138_p2 = scmp.ge.s32.totalorder %s141_s3, 2  }
 0x178   : > { %2266 = vmatpush3.bf16.msra.mxu1 %v2584_v21  ;;  %vm1993_vm3 = vcmask (%p138_p2), 7168   ;;  %s2862_s6 = smov (%p138_p2), 1e-09   ;;  %s2863_s11 = smov (%p138_p2), [#allocation7]  }
 0x179   : > { %324 = vmatpush1.bf16.msra.mxu0 %v2569_v16  ;;  %2267 = vmatprep.subr.bf16.mxu1 %v2585_v24  ;;  %v437_v16 = vsub.s32 2, %v2992_v36  ;;  %s2048_s12 = sshll.u32 (%p138_p2), %s2863_s11, 4  ;;  %s2049_s12 = int_to_ptr.vmem [resolvable:$true] %s2048_s12 }
 0x17a   : > { %325 = vmatprep.subr.bf16.mxu0 %v2570_v17  ;;  %s2785_s5 = scalar_lea.vmem (%p138_p2), %s2049_s12, 32  ;;  %p2790_p4 = scmp.lt.s32.totalorder (%p138_p2), %s2049_s12, %s2049_s12 }
 0x17b   : > { %v438_v18 = vrot.slane %v149_v34, %v437_v16  ;;  %p2786_p3 = scmp.ne.s32.totalorder (%p138_p2), %s2049_s12, %s2785_s5  ;;  %p2791_p5 = scmp.lt.s32.totalorder (%p138_p2), %s2785_s5, %s2785_s5 }
 0x17c   : > { %2268 = vmatpush3.bf16.msra.mxu1 %v2585_v24 }
 0x17d   : > { %326 = vmatpush1.bf16.msra.mxu0 %v2572_v20  ;;  %2269 = vmatprep.subr.bf16.mxu1 %v2586_v27  ;;  %p2792_p6 = por (%p138_p2), %p2791_p5, %p2790_p4 }
 0x17e   : > { %327 = vmatprep.subr.bf16.mxu0 %v2573_v22 }
 0x17f   :  { %p2793_p7 = pnand (%p138_p2), %p2792_p6, %p2786_p3 }
 0x180   : > { %2270 = vmatpush3.bf16.msra.mxu1 %v2586_v27 }
 0x181   : > { %328 = vmatpush1.bf16.msra.mxu0 %v2575_v23  ;;  %2271 = vmatprep.subr.bf16.mxu1 %v2587_v30 }
 0x182   : > { %329 = vmatprep.subr.bf16.mxu0 %v2576_v25 }
 0x184   : > { %2272 = vmatpush3.bf16.msra.mxu1 %v2587_v30 }
 0x185   : > { %330 = vmatpush1.bf16.msra.mxu0 %v2578_v26  ;;  %2273 = vmatprep.subr.bf16.mxu1 %v2588_v31 }
 0x186   : > { %331 = vmatprep.subr.bf16.mxu0 %v2579_v28 }
 0x188   : > { %2274 = vmatpush3.bf16.msra.mxu1 %v2588_v31 }
 0x189   : > { %332 = vmatpush1.bf16.msra.mxu0 %v2581_v29  ;;  %2275 = vmatprep.subr.bf16.mxu1 %v2589_v32 }
 0x18c   : > { %350 = vmatmul.mubr.bf16.vlgmr.msra.gmra.mrb[0].mxu0 %v152_v8  ;;  %2276 = vmatpush3.bf16.msra.mxu1 %v2589_v32 }
 0x18d   : > { %359 = vmatprep.mubr.bf16.mxu0 %v2857_v63 }
 0x18f   : > { %2278 = vmatmul.mubr.bf16.vlgmr.msra.gmra.mrb[0].mxu1 %v153_v33 }
 0x194   : > { %360 = vmatmul.mubr.bf16.gmra.mrb[4].mxu0 %v153_v33 }
 0x25f   : > { %v351_v37 = vpop.f32.mrb[0].mxu0 }
 0x260   : > { %v353_v39 = vpop.f32.mrb[1].mxu0  ;;  %v423_v42 = vadd.f32 %v422_v35, %v351_v37 }
 0x261   : > { %v355_v40 = vpop.f32.mrb[2].mxu0  ;;  %v431_v46 = vadd.f32 %v430_v38, %v353_v39 }
 0x262   : > { %v424_v43 = vadd.f32 %v422_v35, %v355_v40  ;;  %v357_v45 = vpop.f32.mrb[3].mxu0  ;;  %v2279_v15 = vpop.f32.mrb[0].mxu1 }
 0x263   : > { %v432_v47 = vadd.f32 %v430_v38, %v357_v45  ;;  %v404_v17 = vpop.f32.mrb[1].mxu1  ;;  %v3094_v21 = vadd.f32 %v2279_v15, %v438_v18 }
 0x264   : > { %v483_v48 = vpack.c.bf16 %v424_v43, %v423_v42  ;;  %v2453_v49 = vpack.i.bf16 %v424_v43, %v423_v42  ;;  %v2280_v19 = vpop.f32.mrb[2].mxu1  ;;  %v439_v22 = vadd.f32 %v438_v18, %v404_v17 }
 0x265   : > { %v2448_v50 = vpack.i.bf16 %v432_v47, %v431_v46  ;;  %v531_v51 = vpack.c.bf16 %v432_v47, %v431_v46  ;;  %v407_v20 = vpop.f32.mrb[3].mxu1  ;;  %v3096_v23 = vadd.f32 %v2280_v19, %v438_v18 }
 0x266   : > { %2285 = vmatprep.mubr.msk.bf16.mxu1 %vm587_vm0, %v483_v48  ;;  %v440_v24 = vadd.f32 %v438_v18, %v407_v20 }
 0x267   : > { %2449 = vrot.lane.b32.xlu1 %v2448_v50, %s2858_s20  ;;  %2439 = vrot.lane.b32.xlu0 %v2448_v50, %s2859_s21  ;;  %v361_v53 = vpop.f32.mrb[4].mxu0  ;;  %v595_v54 = vsel %vm587_vm0, %v531_v51, 0 }
 0x268   : > { %2365 = vmatprep.subr.msk.bf16.mxu1 %vm587_vm0, %v531_v51  ;;  %v363_v55 = vpop.f32.mrb[5].mxu0  ;;  %v425_v57 = vadd.f32 %v422_v35, %v361_v53  ;;  %v3098_v25 = vpack.i.bf16 %v440_v24, %v439_v22 }
 0x269   : > { %2282 = vmatpush3.bf16.xpose.msra.mxu1 %v595_v54  ;;  %v365_v56 = vpop.f32.mrb[6].mxu0  ;;  %v433_v8 = vadd.f32 %v430_v38, %v363_v55 }
 0x26a   : > { %v426_v59 = vadd.f32 %v422_v35, %v365_v56  ;;  %v367_v61 = vpop.f32.mrb[7].mxu0 }
 0x26b   : > { %v434_v9 = vadd.f32 %v430_v38, %v367_v61  ;;  %2454 = vrot.lane.b32.xlu1 %v2453_v49, %s2859_s21 }
 0x26c   : > { %v484_v10 = vpack.c.bf16 %v426_v59, %v425_v57  ;;  %v2463_v11 = vpack.i.bf16 %v426_v59, %v425_v57 }
 0x26d   : > { %v2443_v12 = vpack.i.bf16 %v434_v9, %v433_v8  ;;  %v532_v13 = vpack.c.bf16 %v434_v9, %v433_v8 }
 0x26f   : > { %2464 = vrot.lane.b32.xlu1 %v2463_v11, %s2859_s21  ;;  %2444 = vrot.lane.b32.xlu0 %v2443_v12, %s2859_s21  ;;  %v598_v14 = vsel %vm587_vm0, %v532_v13, 0 }
 0x270   : > { %2366 = vmatprep.subr.msk.bf16.mxu1 %vm587_vm0, %v532_v13  ;;  %v579_v13 = vpack.c.bf16 %v440_v24, %v439_v22 }
 0x271   : > { %2284 = vmatpush3.bf16.xpose.msra.mxu1 %v598_v14 }
 0x273   : > { %2479 = vrot.lane.b32.xlu1 %v2443_v12, %s2860_s22  ;;  %2459 = vrot.lane.b32.xlu0 %v2448_v50, %s2860_s22 }
 0x277   : > { %2484 = vrot.lane.b32.xlu1 %v2463_v11, %s2858_s20  ;;  %2469 = vrot.lane.b32.xlu0 %v2443_v12, %s2858_s20 }
 0x278   : > { %2286 = vmatmul.mubr.msk.bf16.vlgmr.msra.gmra.mrb[4].mxu1 %vm587_vm0, %v484_v10 }
 0x27b   : > { %2494 = vrot.lane.b32.xlu1 %v2463_v11, %s2860_s22  ;;  %2474 = vrot.lane.b32.xlu0 %v2453_v49, %s2858_s20 }
 0x27f   : > { %2489 = vrot.lane.b32.xlu0 %v2453_v49, %s2860_s22  ;;  %2499 = vrot.lane.b32.xlu1 %v3098_v25, %s2859_s21 }
 0x2d9   : > { %v2450_v26 = vpop.permute.xlu1 %2449  ;;  %v2440_v27 = vpop.permute.xlu0 %2439 }
 0x2da   : > { %v2452_v28 = vunpack.i.h.bf16 %v2450_v26  ;;  %v2451_v29 = vunpack.i.l.bf16 %v2450_v26  ;;  %v2442_v30 = vunpack.i.h.bf16 %v2440_v27  ;;  %v2441_v31 = vunpack.i.l.bf16 %v2440_v27 }
 0x2dc   : > { %v535_v32 = vpack.c.bf16 %v2452_v28, %v2451_v29  ;;  %v533_v33 = vpack.c.bf16 %v2442_v30, %v2441_v31  ;;  %v580_v31 = vpack.c.bf16 %v3096_v23, %v3094_v21 }
 0x2dd   : > { %v2455_v34 = vpop.permute.xlu1 %2454 }
 0x2de   : > { %v2457_v35 = vunpack.i.h.bf16 %v2455_v34  ;;  %v2456_v37 = vunpack.i.l.bf16 %v2455_v34  ;;  %2367 = vmatprep.subr.msk.bf16.mxu1 %vm587_vm0, %v533_v33  ;;  %2369 = vmatprep.subr.msk.bf16.mxu0 %vm587_vm0, %v535_v32  ;;  %v656_v38 = vsel %vm587_vm0, %v533_v33, 0  ;;  %v717_v39 = vsel %vm587_vm0, %v535_v32, 0 }
 0x2df   : > { %2290 = vmatpush3.bf16.xpose.msra.mxu1 %v656_v38  ;;  %2298 = vmatpush3.bf16.xpose.msra.mxu0 %v717_v39 }
 0x2e0   : > { %v485_v40 = vpack.c.bf16 %v2457_v35, %v2456_v37 }
 0x2e1   : > { %v2445_v42 = vpop.permute.xlu0 %2444  ;;  %v2465_v43 = vpop.permute.xlu1 %2464 }
 0x2e2   : > { %v2447_v45 = vunpack.i.h.bf16 %v2445_v42  ;;  %v2446_v46 = vunpack.i.l.bf16 %v2445_v42  ;;  %2293 = vmatprep.mubr.msk.bf16.mxu1 %vm587_vm0, %v485_v40  ;;  %v2467_v55 = vunpack.i.h.bf16 %v2465_v43  ;;  %v2466_v56 = vunpack.i.l.bf16 %v2465_v43 }
 0x2e4   : > { %v534_v47 = vpack.c.bf16 %v2447_v45, %v2446_v46  ;;  %v486_v11 = vpack.c.bf16 %v2467_v55, %v2466_v56 }
 0x2e5   : > { %v2460_v48 = vpop.permute.xlu0 %2459  ;;  %v2480_v53 = vpop.permute.xlu1 %2479 }
 0x2e6   : > { %v2462_v49 = vunpack.i.h.bf16 %v2460_v48  ;;  %v2461_v50 = vunpack.i.l.bf16 %v2460_v48  ;;  %2368 = vmatprep.subr.msk.bf16.mxu1 %vm587_vm0, %v534_v47  ;;  %v659_v51 = vsel %vm587_vm0, %v534_v47, 0  ;;  %v2482_v8 = vunpack.i.h.bf16 %v2480_v53 }
 0x2e7   : > { %2292 = vmatpush3.bf16.xpose.msra.mxu1 %v659_v51  ;;  %v2481_v9 = vunpack.i.l.bf16 %v2480_v53 }
 0x2e8   : > { %v537_v54 = vpack.c.bf16 %v2462_v49, %v2461_v50 }
 0x2e9   : > { %v2470_v57 = vpop.permute.xlu0 %2469  ;;  %v2485_v14 = vpop.permute.xlu1 %2484  ;;  %v538_v17 = vpack.c.bf16 %v2482_v8, %v2481_v9 }
 0x2ea   : > { %v2472_v59 = vunpack.i.h.bf16 %v2470_v57  ;;  %v2471_v61 = vunpack.i.l.bf16 %v2470_v57  ;;  %2371 = vmatprep.subr.msk.bf16.mxu1 %vm587_vm0, %v537_v54  ;;  %v778_v19 = vsel %vm587_vm0, %v537_v54, 0  ;;  %v2487_v26 = vunpack.i.h.bf16 %v2485_v14 }
 0x2eb   : > { %v2486_v27 = vunpack.i.l.bf16 %v2485_v14  ;;  %v781_v33 = vsel %vm587_vm0, %v538_v17, 0 }
 0x2ec   : > { %v536_v10 = vpack.c.bf16 %v2472_v59, %v2471_v61 }
 0x2ed   : > { %v2475_v12 = vpop.permute.xlu0 %2474  ;;  %v488_v30 = vpack.c.bf16 %v2487_v26, %v2486_v27  ;;  %v2495_v32 = vpop.permute.xlu1 %2494 }
 0x2ee   : > { %v2477_v15 = vunpack.i.h.bf16 %v2475_v12  ;;  %v2476_v16 = vunpack.i.l.bf16 %v2475_v12  ;;  %2370 = vmatprep.subr.msk.bf16.mxu0 %vm587_vm0, %v536_v10  ;;  %2294 = vmatmul.mubr.msk.bf16.vlgmr.msra.gmra.mrb[8].mxu1 %vm587_vm0, %v486_v11  ;;  %v720_v18 = vsel %vm587_vm0, %v536_v10, 0  ;;  %v2497_v34 = vunpack.i.h.bf16 %v2495_v32 }
 0x2ef   : > { %2300 = vmatpush3.bf16.xpose.msra.mxu0 %v720_v18  ;;  %2306 = vmatpush3.bf16.xpose.msra.mxu1 %v778_v19  ;;  %v2496_v35 = vunpack.i.l.bf16 %v2495_v32 }
 0x2f0   : > { %v487_v20 = vpack.c.bf16 %v2477_v15, %v2476_v16  ;;  %2372 = vmatprep.subr.msk.bf16.mxu1 %vm587_vm0, %v538_v17  ;;  %2313 = vmatprep.subr.bf16.mxu0 %v579_v13 }
 0x2f1   : > { %v2490_v22 = vpop.permute.xlu0 %2489  ;;  %v490_v37 = vpack.c.bf16 %v2497_v34, %v2496_v35  ;;  %v2500_v53 = vpop.permute.xlu1 %2499 }
 0x2f2   : > { %v2492_v24 = vunpack.i.h.bf16 %v2490_v22  ;;  %v2491_v28 = vunpack.i.l.bf16 %v2490_v22  ;;  %2301 = vmatprep.mubr.msk.bf16.mxu0 %vm587_vm0, %v487_v20  ;;  %v2502_v54 = vunpack.i.h.bf16 %v2500_v53  ;;  %v2501_v55 = vunpack.i.l.bf16 %v2500_v53 }
 0x2f3   : > { %v3208_v53 = vpack.i.bf16 %v3096_v23, %v3094_v21 }
 0x2f4   : > { %v489_v29 = vpack.c.bf16 %v2492_v24, %v2491_v28  ;;  %v581_v56 = vpack.c.bf16 %v2502_v54, %v2501_v55 }
 0x2f6   : > { %2309 = vmatprep.mubr.msk.bf16.mxu1 %vm587_vm0, %v489_v29  ;;  %2302 = vmatmul.mubr.msk.bf16.vlgmr.msra.gmra.mrb[8].mxu0 %vm587_vm0, %v488_v30 }
 0x2f7   : > { %2308 = vmatpush3.bf16.xpose.msra.mxu1 %v781_v33  ;;  %2314 = vmatpush3.bf16.msra.mxu0 %v579_v13 }
 0x2f8   : > { %2315 = vmatprep.subr.bf16.mxu0 %v580_v31  ;;  %2321 = vmatprep.subr.bf16.mxu1 %v581_v56 }
 0x2fb   : > { %2316 = vmatpush3.bf16.msra.mxu0 %v580_v31 }
 0x2fe   : > { %2310 = vmatmul.mubr.msk.bf16.vlgmr.msra.gmra.mrb[12].mxu1 %vm587_vm0, %v490_v37 }
 0x2ff   : > { %2322 = vmatpush3.bf16.msra.mxu1 %v581_v56 }
 0x34b   : > { %v2287_v38 = vpop.f32.mrb[4].mxu1 }
 0x34c   : > { %v3123_v39 = vadd.f32 %v2287_v38, %v2973_v6  ;;  %v634_v40 = vpop.f32.mrb[5].mxu1 }
 0x34d   : > { %v2288_v42 = vpop.f32.mrb[6].mxu1  ;;  %v3126_v43 = vadd.f32 %v634_v40, %v2963_v4 }
 0x34e   : > { %v637_v45 = vpop.f32.mrb[7].mxu1  ;;  %v838_v46 = vsel %vm587_vm0, %v3123_v39, -inf  ;;  %v3136_v49 = vadd.f32 %v2288_v42, %v2978_v7 }
 0x34f   : > { %v3131_v47 = vadd.f32 %v637_v45, %v2968_v5  ;;  %839 = vmax.xlane.f32.xlu0 %v838_v46  ;;  %v832_v50 = vsel %vm587_vm0, %v3126_v43, -inf }
 0x350   : > { %v841_v51 = vsel %vm587_vm0, %v3136_v49, -inf }
 0x351   : > { %v835_v48 = vsel %vm587_vm0, %v3131_v47, -inf }
 0x352   : > { %836 = vmax.xlane.f32.xlu1 %v835_v48 }
 0x353   : > { %833 = vmax.xlane.f32.xlu0 %v832_v50 }
 0x357   : > { %842 = vmax.xlane.f32.xlu0 %v841_v51 }
 0x3c1   : > { %v2295_v57 = vpop.f32.mrb[8].mxu1 }
 0x3c2   : > { %v3143_v59 = vadd.f32 %v2295_v57, %v2973_v6  ;;  %v695_v61 = vpop.f32.mrb[9].mxu1 }
 0x3c3   : > { %v2296_v8 = vpop.f32.mrb[10].mxu1  ;;  %v3156_v17 = vadd.f32 %v695_v61, %v2963_v4 }
 0x3c4   : > { %v3146_v9 = vadd.f32 %v2296_v8, %v2978_v7  ;;  %v698_v10 = vpop.f32.mrb[11].mxu1  ;;  %v850_v11 = vsel %vm587_vm0, %v3143_v59, -inf }
 0x3c5   : > { %851 = vmax.xlane.f32.xlu1 %v850_v11  ;;  %v3164_v26 = vadd.f32 %v698_v10, %v2968_v5  ;;  %v844_v24 = vsel %vm587_vm0, %v3156_v17, -inf }
 0x3c6   : > { %v853_v12 = vsel %vm587_vm0, %v3146_v9, -inf }
 0x3c7   : > { %854 = vmax.xlane.f32.xlu0 %v853_v12  ;;  %v847_v31 = vsel %vm587_vm0, %v3164_v26, -inf }
 0x3c9   : > { %v2303_v13 = vpop.f32.mrb[8].mxu0 }
 0x3ca   : > { %v3153_v14 = vadd.f32 %v2303_v13, %v2973_v6  ;;  %v756_v15 = vpop.f32.mrb[9].mxu0 }
 0x3cb   : > { %v2304_v16 = vpop.f32.mrb[10].mxu0  ;;  %v3169_v22 = vadd.f32 %v756_v15, %v2963_v4 }
 0x3cc   : > { %v3159_v18 = vadd.f32 %v2304_v16, %v2978_v7  ;;  %v759_v19 = vpop.f32.mrb[11].mxu0  ;;  %v862_v20 = vsel %vm587_vm0, %v3153_v14, -inf }
 0x3cd   : > { %863 = vmax.xlane.f32.xlu1 %v862_v20  ;;  %v3174_v29 = vadd.f32 %v759_v19, %v2968_v5  ;;  %v856_v35 = vsel %vm587_vm0, %v3169_v22, -inf }
 0x3ce   : > { %v865_v27 = vsel %vm587_vm0, %v3159_v18, -inf }
 0x3cf   : > { %866 = vmax.xlane.f32.xlu0 %v865_v27  ;;  %v859_v38 = vsel %vm587_vm0, %v3174_v29, -inf }
 0x3d1   : > { %v2311_v28 = vpop.f32.mrb[12].mxu1  ;;  %845 = vmax.xlane.f32.xlu1 %v844_v24 }
 0x3d2   : > { %v817_v30 = vpop.f32.mrb[13].mxu1  ;;  %v3179_v33 = vadd.f32 %v2311_v28, %v2973_v6 }
 0x3d3   : > { %v2312_v32 = vpop.f32.mrb[14].mxu1  ;;  %848 = vmax.xlane.f32.xlu0 %v847_v31  ;;  %v3189_v40 = vadd.f32 %v817_v30, %v2963_v4 }
 0x3d4   : > { %v820_v34 = vpop.f32.mrb[15].mxu1  ;;  %v3184_v37 = vadd.f32 %v2312_v32, %v2978_v7  ;;  %v874_v42 = vsel %vm587_vm0, %v3179_v33, -inf }
 0x3d5   : > { %857 = vmax.xlane.f32.xlu1 %v856_v35  ;;  %v3194_v45 = vadd.f32 %v820_v34, %v2968_v5  ;;  %v868_v48 = vsel %vm587_vm0, %v3189_v40, -inf }
 0x3d6   : > { %v877_v46 = vsel %vm587_vm0, %v3184_v37, -inf }
 0x3d7   : > { %860 = vmax.xlane.f32.xlu0 %v859_v38  ;;  %v871_v50 = vsel %vm587_vm0, %v3194_v45, -inf }
 0x3d9   : > { %875 = vmax.xlane.f32.xlu1 %v874_v42 }
 0x3db   : > { %878 = vmax.xlane.f32.xlu0 %v877_v46 }
 0x3dc   : > { %v840_v51 = vpop.xlane.xlu0 %839 }
 0x3dd   : > { %869 = vmax.xlane.f32.xlu1 %v868_v48  ;;  %v882_v61 = vsub.f32 %v3123_v39, %v840_v51 }
 0x3df   : > { %872 = vmax.xlane.f32.xlu0 %v871_v50  ;;  %v837_v57 = vpop.xlane.xlu1 %836  ;;  %v900_v11 = vmul.f32 1.442695, %v882_v61 }
 0x3e0   : > { %v834_v54 = vpop.xlane.xlu0 %833  ;;  %v881_v8 = vsub.f32 %v3131_v47, %v837_v57 }
 0x3e2   : > { %v898_v12 = vmul.f32 1.442695, %v881_v8 }
 0x3e4   : > { %v843_v55 = vpop.xlane.xlu0 %842 }
 0x3e5   : > { %v883_v56 = vsub.f32 %v3136_v49, %v843_v55 }
 0x3e7   : > { %v902_v10 = vmul.f32 1.442695, %v883_v56 }
 0x3e9   : > { %2638 = vpow2.f32 %v902_v10 }
 0x3ea   : > { %2640 = vpow2.f32 %v900_v11 }
 0x3eb   : > { %2642 = vpow2.f32 %v898_v12 }
 0x3ee   : > { %2509 = vrot.lane.b32.xlu1 %v3098_v25, %s2858_s20 }
 0x3f2   : > { %2514 = vrot.lane.b32.xlu1 %v3098_v25, %s2860_s22  ;;  %v880_v25 = vsub.f32 %v3126_v43, %v834_v54 }
 0x3f3   : > { %v3216_v23 = vpop.eup %2638 }
 0x3f4   : > { %v896_v21 = vmul.f32 1.442695, %v880_v25  ;;  %v3218_v13 = vpop.eup %2640  ;;  %v937_v49 = vsel %vm587_vm0, %v3216_v23, 0.0 }
 0x3f5   : > { %2504 = vrot.lane.b32.xlu0 %v3208_v53, %s2859_s21  ;;  %v3222_v39 = vpop.eup %2642  ;;  %v934_v47 = vsel %vm587_vm0, %v3218_v13, 0.0 }
 0x3f6   : > { %2644 = vpow2.f32 %v896_v21  ;;  %v931_v15 = vsel %vm587_vm0, %v3222_v39, 0.0 }
 0x400   : > { %v3226_v43 = vpop.eup %2644 }
 0x401   : > { %v928_v16 = vsel %vm587_vm0, %v3226_v43, 0.0 }
 0x414   : > { %938 = vadd.xlane.f32.xlu0 %v937_v49 }
 0x416   : > { %935 = vadd.xlane.f32.xlu1 %v934_v47 }
 0x418   : > { %932 = vadd.xlane.f32.xlu0 %v931_v15 }
 0x41a   : > { %929 = vadd.xlane.f32.xlu1 %v928_v16 }
 0x452   : > { %v852_v19 = vpop.xlane.xlu1 %851 }
 0x453   : > { %v886_v20 = vsub.f32 %v3143_v59, %v852_v19 }
 0x454   : > { %v855_v27 = vpop.xlane.xlu0 %854 }
 0x455   : > { %v908_v24 = vmul.f32 1.442695, %v886_v20  ;;  %v887_v28 = vsub.f32 %v3146_v9, %v855_v27 }
 0x457   : > { %2646 = vpow2.f32 %v908_v24  ;;  %v910_v30 = vmul.f32 1.442695, %v887_v28 }
 0x459   : > { %2648 = vpow2.f32 %v910_v30 }
 0x45a   : > { %v864_v31 = vpop.xlane.xlu1 %863 }
 0x45b   : > { %v890_v32 = vsub.f32 %v3153_v14, %v864_v31 }
 0x45c   : > { %v867_v34 = vpop.xlane.xlu0 %866 }
 0x45d   : > { %v916_v35 = vmul.f32 1.442695, %v890_v32  ;;  %v891_v38 = vsub.f32 %v3159_v18, %v867_v34 }
 0x45e   : > { %v846_v42 = vpop.xlane.xlu1 %845 }
 0x45f   : > { %2650 = vpow2.f32 %v916_v35  ;;  %v918_v46 = vmul.f32 1.442695, %v891_v38  ;;  %v884_v48 = vsub.f32 %v3156_v17, %v846_v42 }
 0x460   : > { %v849_v59 = vpop.xlane.xlu0 %848 }
 0x461   : > { %v3237_v50 = vpop.eup %2646  ;;  %2652 = vpow2.f32 %v918_v46  ;;  %v904_v9 = vmul.f32 1.442695, %v884_v48  ;;  %v885_v51 = vsub.f32 %v3164_v26, %v849_v59 }
 0x462   : > { %v858_v54 = vpop.xlane.xlu1 %857  ;;  %v946_v14 = vsel %vm587_vm0, %v3237_v50, 0.0 }
 0x463   : > { %v3242_v55 = vpop.eup %2648  ;;  %2654 = vpow2.f32 %v904_v9  ;;  %v906_v18 = vmul.f32 1.442695, %v885_v51  ;;  %v888_v56 = vsub.f32 %v3169_v22, %v858_v54  ;;  %947 = vadd.xlane.f32.xlu1 %v946_v14 }
 0x464   : > { %v861_v57 = vpop.xlane.xlu0 %860  ;;  %v949_v17 = vsel %vm587_vm0, %v3242_v55, 0.0 }
 0x465   : > { %2656 = vpow2.f32 %v906_v18  ;;  %v912_v61 = vmul.f32 1.442695, %v888_v56  ;;  %v889_v8 = vsub.f32 %v3174_v29, %v861_v57  ;;  %950 = vadd.xlane.f32.xlu0 %v949_v17 }
 0x466   : > { %v876_v26 = vpop.xlane.xlu1 %875 }
 0x467   : > { %2658 = vpow2.f32 %v912_v61  ;;  %v914_v10 = vmul.f32 1.442695, %v889_v8  ;;  %v894_v11 = vsub.f32 %v3179_v33, %v876_v26 }
 0x468   : > { %v879_v25 = vpop.xlane.xlu0 %878 }
 0x469   : > { %v3249_v12 = vpop.eup %2650  ;;  %2660 = vpow2.f32 %v914_v10  ;;  %v924_v22 = vmul.f32 1.442695, %v894_v11  ;;  %v895_v21 = vsub.f32 %v3184_v37, %v879_v25 }
 0x46a   : > { %v870_v49 = vpop.xlane.xlu1 %869  ;;  %v958_v47 = vsel %vm587_vm0, %v3249_v12, 0.0 }
 0x46b   : > { %v3254_v15 = vpop.eup %2652  ;;  %2662 = vpow2.f32 %v924_v22  ;;  %v926_v29 = vmul.f32 1.442695, %v895_v21  ;;  %v892_v16 = vsub.f32 %v3189_v40, %v870_v49  ;;  %959 = vadd.xlane.f32.xlu1 %v958_v47 }
 0x46c   : > { %v873_v19 = vpop.xlane.xlu0 %872  ;;  %v961_v33 = vsel %vm587_vm0, %v3254_v15, 0.0 }
 0x46d   : > { %v3259_v20 = vpop.eup %2654  ;;  %2664 = vpow2.f32 %v926_v29  ;;  %v920_v27 = vmul.f32 1.442695, %v892_v16  ;;  %v893_v37 = vsub.f32 %v3194_v45, %v873_v19  ;;  %962 = vadd.xlane.f32.xlu0 %v961_v33 }
 0x46e   : > { %v2510_v24 = vpop.permute.xlu1 %2509  ;;  %v940_v28 = vsel %vm587_vm0, %v3259_v20, 0.0 }
 0x46f   : > { %v3264_v30 = vpop.eup %2656  ;;  %2666 = vpow2.f32 %v920_v27  ;;  %v922_v40 = vmul.f32 1.442695, %v893_v37  ;;  %v2512_v31 = vunpack.i.h.bf16 %v2510_v24  ;;  %v2511_v32 = vunpack.i.l.bf16 %v2510_v24  ;;  %941 = vadd.xlane.f32.xlu1 %v940_v28 }
 0x470   : > { %v2505_v34 = vpop.permute.xlu0 %2504  ;;  %v943_v35 = vsel %vm587_vm0, %v3264_v30, 0.0 }
 0x471   : > { %v3268_v38 = vpop.eup %2658  ;;  %2668 = vpow2.f32 %v922_v40  ;;  %v583_v45 = vpack.c.bf16 %v2512_v31, %v2511_v32  ;;  %v2507_v42 = vunpack.i.h.bf16 %v2505_v34  ;;  %v2506_v46 = vunpack.i.l.bf16 %v2505_v34  ;;  %944 = vadd.xlane.f32.xlu0 %v943_v35 }
 0x472   : > { %v2515_v48 = vpop.permute.xlu1 %2514  ;;  %v952_v59 = vsel %vm587_vm0, %v3268_v38, 0.0 }
 0x473   : > { %v3272_v9 = vpop.eup %2660  ;;  %v582_v51 = vpack.c.bf16 %v2507_v42, %v2506_v46  ;;  %v2517_v54 = vunpack.i.h.bf16 %v2515_v48  ;;  %v2516_v14 = vunpack.i.l.bf16 %v2515_v48  ;;  %2329 = vmatprep.subr.bf16.mxu0 %v583_v45  ;;  %953 = vadd.xlane.f32.xlu1 %v952_v59 }
 0x474   : > { %v955_v18 = vsel %vm587_vm0, %v3272_v9, 0.0 }
 0x475   : > { %v3276_v56 = vpop.eup %2662  ;;  %v3278_v57 = vpack.c.bf16 %v2517_v54, %v2516_v14  ;;  %956 = vadd.xlane.f32.xlu0 %v955_v18  ;;  %2323 = vmatprep.subr.bf16.mxu1 %v582_v51 }
 0x476   : > { %2324 = vmatpush3.bf16.msra.mxu1 %v582_v51  ;;  %v970_v17 = vsel %vm587_vm0, %v3276_v56, 0.0 }
 0x477   : > { %v3282_v61 = vpop.eup %2664  ;;  %971 = vadd.xlane.f32.xlu1 %v970_v17  ;;  %2337 = vmatprep.subr.bf16.mxu1 %v3278_v57 }
 0x478   : > { %v973_v8 = vsel %vm587_vm0, %v3282_v61, 0.0 }
 0x479   : > { %v3287_v26 = vpop.eup %2666  ;;  %974 = vadd.xlane.f32.xlu0 %v973_v8 }
 0x47a   : > { %v964_v10 = vsel %vm587_vm0, %v3287_v26, 0.0 }
 0x47b   : > { %v3291_v11 = vpop.eup %2668  ;;  %965 = vadd.xlane.f32.xlu1 %v964_v10 }
 0x47c   : > { %v967_v25 = vsel %vm587_vm0, %v3291_v11, 0.0 }
 0x47d   : > { %968 = vadd.xlane.f32.xlu0 %v967_v25 }
 0x48c   : > { %2524 = vrot.lane.b32.xlu1 %v3208_v53, %s2860_s22 }
 0x493   : > { %2519 = vrot.lane.b32.xlu0 %v3208_v53, %s2858_s20 }
 0x4a1   : > { %v939_v22 = vpop.xlane.xlu0 %938 }
 0x4a3   : > { %v936_v21 = vpop.xlane.xlu1 %935 }
 0x4a4   : > { %2670 = vrcp.f32 %v936_v21 }
 0x4a5   : > { %v933_v49 = vpop.xlane.xlu0 %932 }
 0x4a6   : > { %2672 = vrcp.f32 %v933_v49 }
 0x4a7   : > { %2674 = vrcp.f32 %v939_v22  ;;  %v930_v47 = vpop.xlane.xlu1 %929 }
 0x4a8   : > { %2676 = vrcp.f32 %v930_v47 }
 0x4ae   : > { %v2671_v29 = vpop.eup %2670 }
 0x4af   : > { %v994_v27 = vmul.f32 %v2671_v29, %v3218_v13 }
 0x4b0   : > { %v2673_v16 = vpop.eup %2672 }
 0x4b1   : > { %v2675_v19 = vpop.eup %2674  ;;  %v993_v24 = vmul.f32 %v2673_v16, %v3222_v39 }
 0x4b2   : > { %v2677_v33 = vpop.eup %2676  ;;  %v995_v53 = vmul.f32 %v2675_v19, %v3216_v23 }
 0x4b3   : > { %v992_v37 = vmul.f32 %v2677_v33, %v3226_v43 }
 0x4b4   : > { %v1009_v40 = vpack.c.bf16 %v995_v53, %v994_v27 }
 0x4b5   : > { %v1008_v28 = vpack.c.bf16 %v993_v24, %v992_v37 }
 0x4b7   : > { %2317 = vmatprep.mubr.msk.bf16.mxu0 %vm587_vm0, %v1008_v28 }
 0x4b8   : > { %2318 = vmatmul.mubr.msk.bf16.vlgmr.msra.gmra.mrb[12].mxu0 %vm587_vm0, %v1009_v40 }
 0x4b9   : > { %2330 = vmatpush3.bf16.msra.mxu0 %v583_v45 }
 0x4f0   : > { %v948_v31 = vpop.xlane.xlu1 %947 }
 0x4f2   : > { %v951_v32 = vpop.xlane.xlu0 %950 }
 0x4f3   : > { %2678 = vrcp.f32 %v951_v32 }
 0x4f8   : > { %v960_v34 = vpop.xlane.xlu1 %959 }
 0x4fa   : > { %v963_v35 = vpop.xlane.xlu0 %962 }
 0x4fc   : > { %v942_v42 = vpop.xlane.xlu1 %941 }
 0x4fd   : > { %2680 = vrcp.f32 %v942_v42  ;;  %v2679_v46 = vpop.eup %2678 }
 0x4fe   : > { %2682 = vrcp.f32 %v948_v31  ;;  %v945_v13 = vpop.xlane.xlu0 %944  ;;  %v999_v14 = vmul.f32 %v2679_v46, %v3242_v55 }
 0x4ff   : > { %2684 = vrcp.f32 %v945_v13 }
 0x500   : > { %v954_v39 = vpop.xlane.xlu1 %953 }
 0x501   : > { %2686 = vrcp.f32 %v954_v39 }
 0x502   : > { %v957_v23 = vpop.xlane.xlu0 %956 }
 0x503   : > { %2688 = vrcp.f32 %v957_v23 }
 0x504   : > { %2690 = vrcp.f32 %v963_v35  ;;  %v972_v43 = vpop.xlane.xlu1 %971 }
 0x505   : > { %2692 = vrcp.f32 %v960_v34 }
 0x506   : > { %v975_v48 = vpop.xlane.xlu0 %974 }
 0x507   : > { %v2681_v45 = vpop.eup %2680  ;;  %2694 = vrcp.f32 %v975_v48  ;;  %v2594_v48 = vld [vmem:[%s3326_s24 + $0x20] sm:$0xff]  }
 0x508   : > { %v2683_v59 = vpop.eup %2682  ;;  %v966_v51 = vpop.xlane.xlu1 %965  ;;  %v996_v17 = vmul.f32 %v2681_v45, %v3259_v20  ;;  %v2595_v45 = vld [vmem:[%s3326_s24 + $0x28] sm:$0xff]  }
 0x509   : > { %v2685_v54 = vpop.eup %2684  ;;  %2696 = vrcp.f32 %v966_v51  ;;  %v998_v25 = vmul.f32 %v2683_v59, %v3237_v50 }
 0x50a   : > { %2698 = vrcp.f32 %v972_v43  ;;  %v969_v18 = vpop.xlane.xlu0 %968  ;;  %v997_v8 = vmul.f32 %v2685_v54, %v3264_v30 }
 0x50b   : > { %v2687_v10 = vpop.eup %2686  ;;  %2700 = vrcp.f32 %v969_v18  ;;  %v1011_v16 = vpack.c.bf16 %v999_v14, %v998_v25  ;;  %v2596_v14 = vld [vmem:[%s3326_s24 + $0x30] sm:$0xff]  }
 0x50c   : > { %v2525_v22 = vpop.permute.xlu1 %2524  ;;  %v1010_v21 = vpack.c.bf16 %v997_v8, %v996_v17  ;;  %v1000_v33 = vmul.f32 %v2687_v10, %v3268_v38  ;;  %v2597_v10 = vld [vmem:[%s3326_s24 + $0x38] sm:$0xff]  }
 0x50d   : > { %v2689_v49 = vpop.eup %2688  ;;  %v2527_v47 = vunpack.i.h.bf16 %v2525_v22  ;;  %v2526_v29 = vunpack.i.l.bf16 %v2525_v22 }
 0x50e   : > { %v2691_v19 = vpop.eup %2690  ;;  %2325 = vmatprep.mubr.msk.bf16.mxu1 %vm587_vm0, %v1010_v21  ;;  %v2520_v55 = vpop.permute.xlu0 %2519  ;;  %v1001_v20 = vmul.f32 %v2689_v49, %v3272_v9 }
 0x50f   : > { %v586_v27 = vpack.c.bf16 %v2527_v47, %v2526_v29  ;;  %v2522_v30 = vunpack.i.h.bf16 %v2520_v55  ;;  %v2521_v37 = vunpack.i.l.bf16 %v2520_v55  ;;  %2326 = vmatmul.mubr.msk.bf16.vlgmr.msra.gmra.mrb[16].mxu1 %vm587_vm0, %v1011_v16  ;;  %v2693_v50 = vpop.eup %2692  ;;  %v1003_v53 = vmul.f32 %v2691_v19, %v3254_v15 }
 0x510   : > { %2338 = vmatpush3.bf16.msra.mxu1 %v3278_v57  ;;  %v1012_v24 = vpack.c.bf16 %v1001_v20, %v1000_v33  ;;  %v1002_v38 = vmul.f32 %v2693_v50, %v3249_v12  ;;  %v2590_v12 = vld [vmem:[%s3326_s24] sm:$0xff]  }
 0x511   : > { %v584_v28 = vpack.c.bf16 %v2522_v30, %v2521_v37  ;;  %2339 = vmatprep.subr.bf16.mxu1 %v586_v27  ;;  %v2695_v40 = vpop.eup %2694 }
 0x512   : > { %2333 = vmatprep.mubr.msk.bf16.mxu0 %vm587_vm0, %v1012_v24  ;;  %v1007_v34 = vmul.f32 %v2695_v40, %v3282_v61  ;;  %v1013_v57 = vpack.c.bf16 %v1003_v53, %v1002_v38  ;;  %v2592_v61 = vld [vmem:[%s3326_s24 + $0x10] sm:$0xff]  }
 0x513   : > { %v2697_v31 = vpop.eup %2696  ;;  %2331 = vmatprep.subr.bf16.mxu0 %v584_v28 }
 0x514   : > { %v2699_v9 = vpop.eup %2698  ;;  %2340 = vmatpush3.bf16.msra.mxu1 %v586_v27  ;;  %2332 = vmatpush3.bf16.msra.mxu0 %v584_v28  ;;  %v1004_v35 = vmul.f32 %v2697_v31, %v3287_v26  ;;  %v2593_v26 = vld [vmem:[%s3326_s24 + $0x18] sm:$0xff]  }
 0x515   : > { %v2701_v32 = vpop.eup %2700  ;;  %v1006_v42 = vmul.f32 %v2699_v9, %v3276_v56  ;;  %v2591_v56 = vld [vmem:[%s3326_s24 + $0x8] sm:$0xff]   ;;  %2345 = vmatprep.subr.bf16.mxu0 %v2590_v12 }
 0x516   : > { %v1005_v15 = vmul.f32 %v2701_v32, %v3291_v11 }
 0x517   : > { %2334 = vmatmul.mubr.msk.bf16.vlgmr.msra.gmra.mrb[16].mxu0 %vm587_vm0, %v1013_v57  ;;  %v1015_v39 = vpack.c.bf16 %v1007_v34, %v1006_v42 }
 0x518   : > { %v1014_v13 = vpack.c.bf16 %v1005_v15, %v1004_v35  ;;  %2346 = vmatpush3.bf16.msra.mxu0 %v2590_v12 }
 0x519   : > { %2347 = vmatprep.subr.bf16.mxu0 %v2591_v56 }
 0x51a   : > { %2341 = vmatprep.mubr.msk.bf16.mxu1 %vm587_vm0, %v1014_v13 }
 0x51b   : > { %2342 = vmatmul.mubr.msk.bf16.vlgmr.msra.gmra.mrb[20].mxu1 %vm587_vm0, %v1015_v39 }
 0x51c   : > { %1625 = vmatprep.mubr.bf16.mxu1 %v2857_v63  ;;  %2348 = vmatpush3.bf16.msra.mxu0 %v2591_v56 }
 0x51d   : > { %2349 = vmatprep.subr.bf16.mxu0 %v2592_v61 }
 0x520   : > { %2350 = vmatpush3.bf16.msra.mxu0 %v2592_v61 }
 0x521   : > { %2351 = vmatprep.subr.bf16.mxu0 %v2593_v26 }
 0x524   : > { %2352 = vmatpush3.bf16.msra.mxu0 %v2593_v26 }
 0x525   : > { %2353 = vmatprep.subr.bf16.mxu0 %v2594_v48 }
 0x528   : > { %2354 = vmatpush3.bf16.msra.mxu0 %v2594_v48 }
 0x529   : > { %2355 = vmatprep.subr.bf16.mxu0 %v2595_v45 }
 0x52c   : > { %2356 = vmatpush3.bf16.msra.mxu0 %v2595_v45 }
 0x52d   : > { %2357 = vmatprep.subr.bf16.mxu0 %v2596_v14 }
 0x530   : > { %2358 = vmatpush3.bf16.msra.mxu0 %v2596_v14 }
 0x531   : > { %2359 = vmatprep.subr.bf16.mxu0 %v2597_v10 }
 0x534   : > { %2360 = vmatpush3.bf16.msra.mxu0 %v2597_v10 }
 0x58b   : > { %v2319_v11 = vpop.f32.mrb[12].mxu0 }
 0x58c   : > { %v1056_v23 = vpop.f32.mrb[13].mxu0 }
 0x58d   : > { %v2320_v43 = vpop.f32.mrb[14].mxu0 }
 0x58e   : > { %v1059_v46 = vpop.f32.mrb[15].mxu0 }
 0x5e2   : > { %v2327_v59 = vpop.f32.mrb[16].mxu1 }
 0x5e3   : > { %v1111_v51 = vpop.f32.mrb[17].mxu1 }
 0x5e4   : > { %v2328_v54 = vpop.f32.mrb[18].mxu1 }
 0x5e5   : > { %v2528_v18 = vpack.i.bf16 %v2328_v54, %v2327_v59  ;;  %v1114_v17 = vpop.f32.mrb[19].mxu1 }
 0x5e6   : > { %v2538_v8 = vpack.i.bf16 %v1114_v17, %v1111_v51  ;;  %v3356_v17 = vld [vmem:[%s3070_s19] sm:$0xff] }
 0x5e7   : > { %2529 = vrot.lane.b32.xlu1 %v2528_v18, %s2860_s22  ;;  %v1321_v18 = vsub.s32 3, %v2992_v36 }
 0x5e8   : > { %2539 = vrot.lane.b32.xlu0 %v2538_v8, %s2860_s22 }
 0x5e9   : > { %v1322_v8 = vrot.slane %v3356_v17, %v1321_v18 }
 0x5ea   : > { %v2335_v25 = vpop.f32.mrb[16].mxu0 }
 0x5eb   : > { %v1166_v22 = vpop.f32.mrb[17].mxu0 }
 0x5ec   : > { %v2336_v21 = vpop.f32.mrb[18].mxu0 }
 0x5ed   : > { %v2533_v49 = vpack.i.bf16 %v2336_v21, %v2335_v25  ;;  %v1169_v47 = vpop.f32.mrb[19].mxu0 }
 0x5ee   : > { %v2543_v29 = vpack.i.bf16 %v1169_v47, %v1166_v22  ;;  %v2343_v16 = vpop.f32.mrb[20].mxu1 }
 0x5ef   : > { %2534 = vrot.lane.b32.xlu1 %v2533_v49, %s2858_s20  ;;  %v1221_v19 = vpop.f32.mrb[21].mxu1 }
 0x5f0   : > { %2544 = vrot.lane.b32.xlu0 %v2543_v29, %s2858_s20  ;;  %v2344_v55 = vpop.f32.mrb[22].mxu1 }
 0x5f1   : > { %v2553_v33 = vpack.i.bf16 %v2344_v55, %v2343_v16  ;;  %v1224_v20 = vpop.f32.mrb[23].mxu1 }
 0x5f2   : > { %v2548_v27 = vpack.i.bf16 %v1224_v20, %v1221_v19 }
 0x5f3   : > { %2554 = vrot.lane.b32.xlu1 %v2553_v33, %s2859_s21 }
 0x5f4   : > { %2549 = vrot.lane.b32.xlu0 %v2548_v27, %s2859_s21  ;;  %v2601_v27 = vld [vmem:[%s3367_s1 + $0x10] ss:$8 sps:$4 sm:$0xff]  }
 0x659   : > { %v2530_v30 = vpop.permute.xlu1 %2529 }
 0x65a   : > { %v2540_v37 = vpop.permute.xlu0 %2539  ;;  %v2532_v50 = vunpack.i.h.bf16 %v2530_v30  ;;  %v2531_v24 = vunpack.i.l.bf16 %v2530_v30  ;;  %v2603_v30 = vld [vmem:[%s3367_s1 + $0x14] ss:$8 sps:$4 sm:$0xff]  }
 0x65b   : > { %v2542_v28 = vunpack.i.h.bf16 %v2540_v37  ;;  %v2541_v40 = vunpack.i.l.bf16 %v2540_v37 }
 0x65c   : > { %v1287_v57 = vsel %vm587_vm0, %v2320_v43, %v2532_v50  ;;  %v1286_v35 = vsel %vm587_vm0, %v2319_v11, %v2531_v24 }
 0x65d   : > { %v1285_v42 = vsel %vm587_vm0, %v1059_v46, %v2542_v28  ;;  %v1284_v13 = vsel %vm587_vm0, %v1056_v23, %v2541_v40 }
 0x661   : > { %v2535_v53 = vpop.permute.xlu1 %2534 }
 0x662   : > { %v2545_v31 = vpop.permute.xlu0 %2544  ;;  %v2537_v38 = vunpack.i.h.bf16 %v2535_v53  ;;  %v2536_v9 = vunpack.i.l.bf16 %v2535_v53 }
 0x663   : > { %v2547_v32 = vunpack.i.h.bf16 %v2545_v31  ;;  %v2546_v34 = vunpack.i.l.bf16 %v2545_v31 }
 0x664   : > { %v1291_v61 = vsel %vm1288_vm1, %v1286_v35, %v2536_v9  ;;  %v1292_v26 = vsel %vm1288_vm1, %v1287_v57, %v2537_v38 }
 0x665   : > { %v2555_v15 = vpop.permute.xlu1 %2554  ;;  %v1289_v43 = vsel %vm1288_vm1, %v1284_v13, %v2546_v34  ;;  %v1290_v11 = vsel %vm1288_vm1, %v1285_v42, %v2547_v32  ;;  %v2606_v42 = vld [vmem:[%s3367_s1 + $0x24] ss:$8 sps:$4 sm:$0xff]   ;;  %v2604_v13 = vld [vmem:[%s3367_s1 + $0x20] ss:$8 sps:$4 sm:$0xff]  }
 0x666   : > { %v2557_v39 = vunpack.i.h.bf16 %v2555_v15  ;;  %v2556_v12 = vunpack.i.l.bf16 %v2555_v15  ;;  %v2550_v56 = vpop.permute.xlu0 %2549 }
 0x667   : > { %v2552_v48 = vunpack.i.h.bf16 %v2550_v56  ;;  %v2551_v45 = vunpack.i.l.bf16 %v2550_v56  ;;  %v2612_v56 = vld [vmem:[%s3367_s1 + $0x44] ss:$8 sps:$4 sm:$0xff]  }
 0x668   : > { %v1297_v59 = vsel %vm1293_vm2, %v1292_v26, %v2557_v39  ;;  %v1296_v46 = vsel %vm1293_vm2, %v1291_v61, %v2556_v12  ;;  %v2609_v39 = vld [vmem:[%s3367_s1 + $0x34] ss:$8 sps:$4 sm:$0xff]   ;;  %v2607_v12 = vld [vmem:[%s3367_s1 + $0x30] ss:$8 sps:$4 sm:$0xff]   ;;  %v2610_v61 = vld [vmem:[%s3367_s1 + $0x40] ss:$8 sps:$4 sm:$0xff]  }
 0x669   : > { %v1299_v51 = vpack.c.bf16 %v1297_v59, %v1296_v46  ;;  %v1294_v23 = vsel %vm1293_vm2, %v1289_v43, %v2551_v45  ;;  %v1295_v54 = vsel %vm1293_vm2, %v1290_v11, %v2552_v48  ;;  %v2615_v26 = vld [vmem:[%s3367_s1 + $0x54] ss:$8 sps:$4 sm:$0xff]   ;;  %v2613_v48 = vld [vmem:[%s3367_s1 + $0x50] ss:$8 sps:$4 sm:$0xff]   ;;  %v2618_v45 = vld [vmem:[%s3367_s1 + $0x64] ss:$8 sps:$4 sm:$0xff]  }
 0x66a   : > { %v1298_v14 = vpack.c.bf16 %v1295_v54, %v1294_v23  ;;  %v2616_v43 = vld [vmem:[%s3367_s1 + $0x60] ss:$8 sps:$4 sm:$0xff]   ;;  %v2621_v11 = vld [vmem:[%s3367_s1 + $0x74] ss:$8 sps:$4 sm:$0xff]   ;;  %v2619_v59 = vld [vmem:[%s3367_s1 + $0x70] ss:$8 sps:$4 sm:$0xff]  }
 0x66c   : > { %2361 = vmatprep.mubr.bf16.mxu0 %v1298_v14 }
 0x66d   : > { %2362 = vmatmul.mubr.bf16.vlgmr.msra.gmra.mrb[20].mxu0 %v1299_v51 }
 0x740   : > { %v2363_v10 = vpop.f32.mrb[20].mxu0 }
 0x741   : > { %v1405_v25 = vpop.f32.mrb[21].mxu0  ;;  %v1414_v47 = vadd.f32 %v2363_v10, %v1322_v8 }
 0x742   : > { %v1406_v22 = vadd.f32 %v1405_v25, %v1322_v8  ;;  %v2364_v21 = vpop.f32.mrb[22].mxu0 }
 0x743   : > { %v1408_v49 = vpop.f32.mrb[23].mxu0  ;;  %v1417_v55 = vadd.f32 %v2364_v21, %v1322_v8  ;;  %v1422_v33 = vadd.f32 %v2839_v60, %v1414_v47 }
 0x744   : > { %v1409_v29 = vadd.f32 %v1408_v49, %v1322_v8  ;;  %v1420_v16 = vadd.f32 %v2847_v52, %v1406_v22  ;;  %v2598_v52 = vld [vmem:[%s3367_s1] ss:$8 sps:$4 sm:$0xff]   ;;  %v1470_v49 = vsub.s32 6, %v2992_v36 }
 0x745   : > { %v1423_v20 = vadd.f32 %v2835_v62, %v1417_v55 }
 0x746   : > { %1424 = vadd.xlane.f32.xlu0 %v1420_v16  ;;  %v1421_v19 = vadd.f32 %v2843_v58, %v1409_v29  ;;  %v2600_v58 = vld [vmem:[%s3367_s1 + $0x4] ss:$8 sps:$4 sm:$0xff]   ;;  %v1471_v29 = vrot.slane %v3356_v17, %v1470_v49 }
 0x747   : > { %1593 = vmatprep.subr.bf16.mxu1 %v2600_v58 }
 0x748   : > { %1426 = vadd.xlane.f32.xlu1 %v1421_v19  ;;  %1594 = vmatpush1.bf16.msra.mxu1 %v2598_v52 }
 0x749   : > { %1595 = vmatprep.subr.bf16.mxu1 %v2603_v30 }
 0x74a   : > { %1428 = vadd.xlane.f32.xlu0 %v1422_v33 }
 0x74c   : > { %1596 = vmatpush1.bf16.msra.mxu1 %v2601_v27 }
 0x74d   : > { %1597 = vmatprep.subr.bf16.mxu1 %v2606_v42  ;;  %v2628_v42 = vld [vmem:[%s3373_s28 + $0x58] sm:$0xff]  }
 0x74e   : > { %1430 = vadd.xlane.f32.xlu0 %v1423_v20 }
 0x750   : > { %1598 = vmatpush1.bf16.msra.mxu1 %v2604_v13  ;;  %v2629_v13 = vld [vmem:[%s3373_s28 + $0x18] sm:$0xff]  }
 0x751   : > { %1599 = vmatprep.subr.bf16.mxu1 %v2609_v39  ;;  %v2630_v39 = vld [vmem:[%s3373_s28 + $0x60] sm:$0xff]  }
 0x754   : > { %1600 = vmatpush1.bf16.msra.mxu1 %v2607_v12  ;;  %v2631_v12 = vld [vmem:[%s3373_s28 + $0x20] sm:$0xff]  }
 0x755   : > { %1601 = vmatprep.subr.bf16.mxu1 %v2612_v56  ;;  %v2632_v56 = vld [vmem:[%s3373_s28 + $0x68] sm:$0xff]  }
 0x758   : > { %1602 = vmatpush1.bf16.msra.mxu1 %v2610_v61  ;;  %v2633_v61 = vld [vmem:[%s3373_s28 + $0x28] sm:$0xff]  }
 0x759   : > { %1603 = vmatprep.subr.bf16.mxu1 %v2615_v26  ;;  %v2634_v26 = vld [vmem:[%s3373_s28 + $0x70] sm:$0xff]  }
 0x75c   : > { %1604 = vmatpush1.bf16.msra.mxu1 %v2613_v48  ;;  %v2635_v48 = vld [vmem:[%s3373_s28 + $0x30] sm:$0xff]  }
 0x75d   : > { %1605 = vmatprep.subr.bf16.mxu1 %v2618_v45  ;;  %v2636_v45 = vld [vmem:[%s3373_s28 + $0x78] sm:$0xff]  }
 0x760   : > { %1606 = vmatpush1.bf16.msra.mxu1 %v2616_v43  ;;  %v2637_v43 = vld [vmem:[%s3373_s28 + $0x38] sm:$0xff]  }
 0x761   : > { %1607 = vmatprep.subr.bf16.mxu1 %v2621_v11  ;;  %v1507_v11 = vsub.s32 4, %v2992_v36 }
 0x764   : > { %1608 = vmatpush1.bf16.msra.mxu1 %v2619_v59  ;;  %v150_v59 = vld [vmem:[%s3070_s19 + $0x8] sm:$0xff] }
 0x7d3   : > { %v1425_v60 = vpop.xlane.xlu0 %1424 }
 0x7d4   : > { %v1432_v62 = vmul.f32 0.0078125, %v1425_v60 }
 0x7d5   : > { %v1427_v37 = vpop.xlane.xlu1 %1426 }
 0x7d6   : > { %v1436_v50 = vsub.f32 %v1420_v16, %v1432_v62  ;;  %v1433_v24 = vmul.f32 0.0078125, %v1427_v37  ;;  %v1478_v16 = vsub.s32 7, %v2992_v36 }
 0x7d7   : > { %v1429_v53 = vpop.xlane.xlu0 %1428 }
 0x7d8   : > { %v1437_v28 = vsub.f32 %v1421_v19, %v1433_v24  ;;  %v1434_v40 = vmul.f32 0.0078125, %v1429_v53  ;;  %v1440_v31 = vmul.f32 %v1436_v50, %v1436_v50  ;;  %v1479_v58 = vrot.slane %v3356_v17, %v1478_v16 }
 0x7da   : > { %v3375_v38 = vsub.f32 %v1422_v33, %v1434_v40  ;;  %1444 = vadd.xlane.f32.xlu1 %v1440_v31  ;;  %v1441_v9 = vmul.f32 %v1437_v28, %v1437_v28 }
 0x7db   : > { %v1431_v32 = vpop.xlane.xlu0 %1430 }
 0x7dc   : > { %v1435_v34 = vmul.f32 0.0078125, %v1431_v32  ;;  %1446 = vadd.xlane.f32.xlu0 %v1441_v9  ;;  %v1442_v57 = vmul.f32 %v3375_v38, %v3375_v38  ;;  %v2622_v32 = vld [vmem:[%s3373_s28 + $0x40] sm:$0xff]  }
 0x7dd   : > { %2233 = vmatprep.subr.bf16.mxu0 %v2622_v32 }
 0x7de   : > { %v1439_v35 = vsub.f32 %v1423_v20, %v1435_v34  ;;  %1448 = vadd.xlane.f32.xlu1 %v1442_v57  ;;  %v2623_v34 = vld [vmem:[%s3373_s28] sm:$0xff]   ;;  %v2624_v57 = vld [vmem:[%s3373_s28 + $0x48] sm:$0xff]  }
 0x7df   : > { %2234 = vmatpush3.bf16.msra.mxu0 %v2623_v34 }
 0x7e0   : > { %v1443_v15 = vmul.f32 %v1439_v35, %v1439_v35  ;;  %2235 = vmatprep.subr.bf16.mxu0 %v2624_v57 }
 0x7e2   : > { %1450 = vadd.xlane.f32.xlu0 %v1443_v15  ;;  %v2627_v15 = vld [vmem:[%s3373_s28 + $0x10] sm:$0xff]  }
 0x867   : > { %v1445_v46 = vpop.xlane.xlu1 %1444 }
 0x868   : > { %v1452_v51 = vmul.f32 0.0078125, %v1445_v46  ;;  %v1508_v46 = vrot.slane %v3356_v17, %v1507_v11 }
 0x869   : > { %v1447_v23 = vpop.xlane.xlu0 %1446 }
 0x86a   : > { %v1456_v54 = vadd.f32 1e-12, %v1452_v51  ;;  %v1453_v14 = vmul.f32 0.0078125, %v1447_v23  ;;  %v1512_v51 = vrot.slane %v150_v59, %v1507_v11 }
 0x86b   : > { %v1449_v18 = vpop.xlane.xlu1 %1448 }
 0x86c   : > { %2702 = vrsqrt.f32 %v1456_v54  ;;  %v1457_v8 = vadd.f32 1e-12, %v1453_v14  ;;  %v1454_v10 = vmul.f32 0.0078125, %v1449_v18 }
 0x86e   : > { %2704 = vrsqrt.f32 %v1457_v8  ;;  %v1458_v25 = vadd.f32 1e-12, %v1454_v10 }
 0x86f   : > { %v1451_v22 = vpop.xlane.xlu0 %1450 }
 0x870   : > { %2706 = vrsqrt.f32 %v1458_v25  ;;  %v1455_v21 = vmul.f32 0.0078125, %v1451_v22 }
 0x872   : > { %v1459_v47 = vadd.f32 1e-12, %v1455_v21 }
 0x874   : > { %2708 = vrsqrt.f32 %v1459_v47 }
 0x876   : > { %v2703_v19 = vpop.eup %2702 }
 0x877   : > { %v1464_v55 = vmul.f32 %v2703_v19, %v1436_v50 }
 0x878   : > { %v2705_v33 = vpop.eup %2704 }
 0x879   : > { %v1465_v20 = vmul.f32 %v2705_v33, %v1437_v28  ;;  %v1472_v52 = vmul.f32 %v1471_v29, %v1464_v55 }
 0x87a   : > { %v2707_v27 = vpop.eup %2706 }
 0x87b   : > { %v1473_v30 = vmul.f32 %v1471_v29, %v1465_v20  ;;  %v3395_v60 = vadd.f32 %v1479_v58, %v1472_v52  ;;  %v1466_v37 = vmul.f32 %v2707_v27, %v3375_v38 }
 0x87d   : > { %v3397_v62 = vadd.f32 %v1479_v58, %v1473_v30  ;;  %v1474_v28 = vmul.f32 %v1471_v29, %v1466_v37 }
 0x87e   : > { %v2709_v24 = vpop.eup %2708 }
 0x87f   : > { %v1484_v50 = vpack.c.bf16 %v3397_v62, %v3395_v60  ;;  %v1467_v53 = vmul.f32 %v2709_v24, %v1439_v35  ;;  %v3405_v9 = vadd.f32 %v1479_v58, %v1474_v28  ;;  %v2625_v35 = vld [vmem:[%s3373_s28 + $0x8] sm:$0xff]  }
 0x880   : > { %2236 = vmatpush3.bf16.msra.mxu0 %v2625_v35 }
 0x881   : > { %1626 = vmatmul.mubr.bf16.vlgmr.msra.gmra.mrb[24].mxu1 %v1484_v50  ;;  %v1475_v40 = vmul.f32 %v1471_v29, %v1467_v53 }
 0x882   : > { %1635 = vmatprep.mubr.bf16.mxu1 %v2857_v63  ;;  %v2626_v63 = vld [vmem:[%s3373_s28 + $0x50] sm:$0xff]  }
 0x883   : > { %v3403_v31 = vadd.f32 %v1479_v58, %v1475_v40  ;;  %2237 = vmatprep.subr.bf16.mxu0 %v2626_v63 }
 0x884   : > { %2238 = vmatpush3.bf16.msra.mxu0 %v2627_v15 }
 0x885   : > { %v1485_v38 = vpack.c.bf16 %v3403_v31, %v3405_v9  ;;  %2239 = vmatprep.subr.bf16.mxu0 %v2628_v42 }
 0x888   : > { %2240 = vmatpush3.bf16.msra.mxu0 %v2629_v13 }
 0x889   : > { %1636 = vmatmul.mubr.bf16.gmra.mrb[28].mxu1 %v1485_v38  ;;  %2241 = vmatprep.subr.bf16.mxu0 %v2630_v39 }
 0x88c   : > { %2242 = vmatpush3.bf16.msra.mxu0 %v2631_v12 }
 0x88d   : > { %2243 = vmatprep.subr.bf16.mxu0 %v2632_v56 }
 0x890   : > { %2244 = vmatpush3.bf16.msra.mxu0 %v2633_v61 }
 0x891   : > { %2245 = vmatprep.subr.bf16.mxu0 %v2634_v26 }
 0x894   : > { %2246 = vmatpush3.bf16.msra.mxu0 %v2635_v48 }
 0x895   : > { %2247 = vmatprep.subr.bf16.mxu0 %v2636_v45 }
 0x898   : > { %2248 = vmatpush3.bf16.msra.mxu0 %v2637_v43 }
 0x954   : > { %v1627_v23 = vpop.f32.mrb[24].mxu1 }
 0x955   : > { %v3428_v54 = vadd.f32 %v1627_v23, %v1508_v46  ;;  %v1629_v14 = vpop.f32.mrb[25].mxu1 }
 0x956   : > { %v3430_v18 = vadd.f32 %v1629_v14, %v1512_v51  ;;  %v1631_v8 = vpop.f32.mrb[26].mxu1 }
 0x957   : > { %v1646_v10 = vmul.f32 %v3428_v54, %v3428_v54  ;;  %v3434_v25 = vadd.f32 %v1631_v8, %v1508_v46  ;;  %v1633_v22 = vpop.f32.mrb[27].mxu1 }
 0x958   : > { %v1647_v21 = vmul.f32 %v3430_v18, %v3430_v18  ;;  %v3438_v49 = vadd.f32 %v1633_v22, %v1512_v51 }
 0x959   : > { %v1654_v47 = vmul.f32 %v1646_v10, %v3428_v54  ;;  %v1648_v29 = vmul.f32 %v3434_v25, %v3434_v25 }
 0x95a   : > { %v1655_v16 = vmul.f32 %v1647_v21, %v3430_v18  ;;  %v1649_v19 = vmul.f32 %v3438_v49, %v3438_v49 }
 0x95b   : > { %v1662_v55 = vmul.f32 0.044715, %v1654_v47  ;;  %v1656_v33 = vmul.f32 %v1648_v29, %v3434_v25 }
 0x95c   : > { %v1663_v20 = vmul.f32 0.044715, %v1655_v16  ;;  %v1657_v52 = vmul.f32 %v1649_v19, %v3438_v49  ;;  %v1637_v58 = vpop.f32.mrb[28].mxu1 }
 0x95d   : > { %v1670_v27 = vadd.f32 %v1662_v55, %v3428_v54  ;;  %v1664_v30 = vmul.f32 0.044715, %v1656_v33  ;;  %v3449_v37 = vadd.f32 %v1637_v58, %v1508_v46  ;;  %v1639_v24 = vpop.f32.mrb[29].mxu1 }
 0x95e   : > { %v1671_v50 = vadd.f32 %v1663_v20, %v3430_v18  ;;  %v1665_v53 = vmul.f32 0.044715, %v1657_v52  ;;  %v3452_v28 = vadd.f32 %v1639_v24, %v1512_v51  ;;  %v1641_v40 = vpop.f32.mrb[30].mxu1 }
 0x95f   : > { %v1678_v38 = vmul.f32 0.7978846, %v1670_v27  ;;  %v1672_v32 = vadd.f32 %v1664_v30, %v3434_v25  ;;  %v1650_v34 = vmul.f32 %v3449_v37, %v3449_v37  ;;  %v3457_v57 = vadd.f32 %v1641_v40, %v1508_v46  ;;  %v1643_v35 = vpop.f32.mrb[31].mxu1 }
 0x960   : > { %v1679_v63 = vmul.f32 0.7978846, %v1671_v50  ;;  %v1673_v15 = vadd.f32 %v1665_v53, %v3438_v49  ;;  %v1651_v42 = vmul.f32 %v3452_v28, %v3452_v28  ;;  %v3462_v13 = vadd.f32 %v1643_v35, %v1512_v51 }
 0x961   : > { %2710 = vtanh.f32 %v1678_v38  ;;  %v1680_v39 = vmul.f32 0.7978846, %v1672_v32  ;;  %v1658_v12 = vmul.f32 %v1650_v34, %v3449_v37  ;;  %v1652_v56 = vmul.f32 %v3457_v57, %v3457_v57 }
 0x962   : > { %2712 = vtanh.f32 %v1679_v63  ;;  %v1681_v61 = vmul.f32 0.7978846, %v1673_v15  ;;  %v1659_v26 = vmul.f32 %v1651_v42, %v3452_v28  ;;  %v1653_v48 = vmul.f32 %v3462_v13, %v3462_v13 }
 0x963   : > { %2714 = vtanh.f32 %v1680_v39  ;;  %v1666_v45 = vmul.f32 0.044715, %v1658_v12  ;;  %v1660_v43 = vmul.f32 %v1652_v56, %v3457_v57 }
 0x964   : > { %2716 = vtanh.f32 %v1681_v61  ;;  %v1667_v11 = vmul.f32 0.044715, %v1659_v26  ;;  %v1661_v59 = vmul.f32 %v1653_v48, %v3462_v13 }
 0x965   : > { %v1674_v46 = vadd.f32 %v1666_v45, %v3449_v37  ;;  %v1668_v51 = vmul.f32 0.044715, %v1660_v43 }
 0x966   : > { %v1675_v23 = vadd.f32 %v1667_v11, %v3452_v28  ;;  %v1669_v14 = vmul.f32 0.044715, %v1661_v59 }
 0x967   : > { %v1682_v8 = vmul.f32 0.7978846, %v1674_v46  ;;  %v1676_v10 = vadd.f32 %v1668_v51, %v3457_v57 }
 0x968   : > { %v1683_v22 = vmul.f32 0.7978846, %v1675_v23  ;;  %v1677_v21 = vadd.f32 %v1669_v14, %v3462_v13  ;;  %v1758_v23 = vsub.s32 5, %v2992_v36 }
 0x969   : > { %2718 = vtanh.f32 %v1682_v8  ;;  %v1684_v47 = vmul.f32 0.7978846, %v1676_v10 }
 0x96a   : > { %2720 = vtanh.f32 %v1683_v22  ;;  %v1685_v29 = vmul.f32 0.7978846, %v1677_v21  ;;  %v1759_v8 = vrot.slane %v3356_v17, %v1758_v23 }
 0x96b   : > { %v2711_v16 = vpop.eup %2710  ;;  %2722 = vtanh.f32 %v1684_v47 }
 0x96c   : > { %v2713_v19 = vpop.eup %2712  ;;  %v1694_v55 = vadd.f32 1.0, %v2711_v16  ;;  %2724 = vtanh.f32 %v1685_v29 }
 0x96d   : > { %v2715_v33 = vpop.eup %2714  ;;  %v1695_v20 = vadd.f32 1.0, %v2713_v19 }
 0x96e   : > { %v2717_v52 = vpop.eup %2716  ;;  %v1702_v58 = vmul.f32 0.5, %v1694_v55  ;;  %v1696_v27 = vadd.f32 1.0, %v2715_v33 }
 0x96f   : > { %v1697_v30 = vadd.f32 1.0, %v2717_v52  ;;  %v1703_v24 = vmul.f32 0.5, %v1695_v20 }
 0x970   : > { %v1704_v50 = vmul.f32 0.5, %v1696_v27  ;;  %v1710_v40 = vmul.f32 %v1702_v58, %v3428_v54 }
 0x971   : > { %v1705_v53 = vmul.f32 0.5, %v1697_v30  ;;  %v1711_v34 = vmul.f32 %v1703_v24, %v3430_v18 }
 0x972   : > { %v1712_v38 = vmul.f32 %v1704_v50, %v3434_v25 }
 0x973   : > { %v2719_v32 = vpop.eup %2718  ;;  %v1713_v35 = vmul.f32 %v1705_v53, %v3438_v49 }
 0x974   : > { %v2721_v63 = vpop.eup %2720  ;;  %v1718_v15 = vpack.c.bf16 %v1712_v38, %v1710_v40  ;;  %v1698_v42 = vadd.f32 1.0, %v2719_v32 }
 0x975   : > { %v2723_v39 = vpop.eup %2722  ;;  %v1719_v12 = vpack.c.bf16 %v1713_v35, %v1711_v34  ;;  %v1699_v56 = vadd.f32 1.0, %v2721_v63 }
 0x976   : > { %v2725_v61 = vpop.eup %2724  ;;  %v1700_v26 = vadd.f32 1.0, %v2723_v39  ;;  %v1706_v48 = vmul.f32 0.5, %v1698_v42 }
 0x977   : > { %1888 = vmatprep.mubr.bf16.mxu0 %v1719_v12  ;;  %v1701_v45 = vadd.f32 1.0, %v2725_v61  ;;  %v1707_v43 = vmul.f32 0.5, %v1699_v56 }
 0x978   : > { %1889 = vmatmul.mubr.bf16.vlgmr.msra.gmra.mrb[24].mxu0 %v1718_v15  ;;  %v1708_v54 = vmul.f32 0.5, %v1700_v26  ;;  %v1714_v11 = vmul.f32 %v1706_v48, %v3449_v37 }
 0x979   : > { %v1709_v25 = vmul.f32 0.5, %v1701_v45  ;;  %v1715_v49 = vmul.f32 %v1707_v43, %v3452_v28 }
 0x97a   : > { %v1716_v18 = vmul.f32 %v1708_v54, %v3457_v57 }
 0x97b   : > { %v1717_v59 = vmul.f32 %v1709_v25, %v3462_v13 }
 0x97c   : > { %v1720_v46 = vpack.c.bf16 %v1716_v18, %v1714_v11  ;;  %v151_v11 = vld [vmem:[%s3070_s19 + $0x10] sm:$0x3] }
 0x97d   : > { %v1721_v51 = vpack.c.bf16 %v1717_v59, %v1715_v49  ;;  %v1964_v23 = vrot.slane %v151_v11, %v3001_v44 }
 0x97f   : > { %1896 = vmatprep.mubr.bf16.mxu0 %v1721_v51 }
 0x980   : > { %1897 = vmatmul.mubr.bf16.gmra.mrb[28].mxu0 %v1720_v46  ;;  %v1956_v46 = vrot.slane %v151_v11, %v2995_v41 }
 0xa4b   : > { %v2249_v14 = vpop.f32.mrb[24].mxu0 }
 0xa4c   : > { %v2250_v10 = vpop.f32.mrb[25].mxu0 }
 0xa4d   : > { %v2251_v22 = vadd.f32 %v2250_v10, %v2249_v14  ;;  %v2252_v21 = vpop.f32.mrb[26].mxu0 }
 0xa4e   : > { %v2253_v47 = vpop.f32.mrb[27].mxu0 }
 0xa4f   : > { %v1891_v37 = vadd.f32 %v2251_v22, %v1759_v8  ;;  %v2254_v29 = vadd.f32 %v2253_v47, %v2252_v21 }
 0xa51   : > { %v1894_v57 = vadd.f32 %v2254_v29, %v1759_v8  ;;  %v1905_v28 = vadd.f32 %v1891_v37, %v3395_v60 }
 0xa53   : > { %1909 = vadd.xlane.f32.xlu1 %v1905_v28  ;;  %v2255_v13 = vpop.f32.mrb[28].mxu0  ;;  %v1906_v16 = vadd.f32 %v1894_v57, %v3397_v62 }
 0xa54   : > { %v2256_v19 = vpop.f32.mrb[29].mxu0 }
 0xa55   : > { %v2257_v55 = vadd.f32 %v2256_v19, %v2255_v13  ;;  %1911 = vadd.xlane.f32.xlu0 %v1906_v16  ;;  %v2258_v33 = vpop.f32.mrb[30].mxu0 }
 0xa56   : > { %v2259_v20 = vpop.f32.mrb[31].mxu0 }
 0xa57   : > { %v1899_v52 = vadd.f32 %v2257_v55, %v1759_v8  ;;  %v2260_v17 = vadd.f32 %v2259_v20, %v2258_v33  ;;  %v1994_v20 = vsel (%p138_p2), %vm1993_vm3, %v2943_v0, 0.0 }
 0xa59   : > { %v1902_v58 = vadd.f32 %v2260_v17, %v1759_v8  ;;  %v1907_v27 = vadd.f32 %v1899_v52, %v3405_v9  ;;  %v2018_v17 = vsel (%p138_p2), %vm1993_vm3, %v2953_v2, 0.0 }
 0xa5b   : > { %1913 = vadd.xlane.f32.xlu1 %v1907_v27  ;;  %v1908_v30 = vadd.f32 %v1902_v58, %v3403_v31 }
 0xa5d   : > { %1915 = vadd.xlane.f32.xlu0 %v1908_v30 }
 0xae0   : > { %v1910_v24 = vpop.xlane.xlu1 %1909 }
 0xae1   : > { %v1917_v60 = vmul.f32 0.0078125, %v1910_v24 }
 0xae2   : > { %v1912_v50 = vpop.xlane.xlu0 %1911 }
 0xae3   : > { %v1921_v53 = vsub.f32 %v1905_v28, %v1917_v60  ;;  %v1918_v40 = vmul.f32 0.0078125, %v1912_v50 }
 0xae5   : > { %v1922_v62 = vsub.f32 %v1906_v16, %v1918_v40  ;;  %v1925_v38 = vmul.f32 %v1921_v53, %v1921_v53 }
 0xae7   : > { %1929 = vadd.xlane.f32.xlu1 %v1925_v38  ;;  %v1926_v32 = vmul.f32 %v1922_v62, %v1922_v62 }
 0xae8   : > { %v1914_v34 = vpop.xlane.xlu1 %1913 }
 0xae9   : > { %v1919_v35 = vmul.f32 0.0078125, %v1914_v34  ;;  %1931 = vadd.xlane.f32.xlu0 %v1926_v32 }
 0xaea   : > { %v1916_v63 = vpop.xlane.xlu0 %1915 }
 0xaeb   : > { %v1923_v15 = vsub.f32 %v1907_v27, %v1919_v35  ;;  %v1920_v42 = vmul.f32 0.0078125, %v1916_v63  ;;  %v2019_v27 = vsel (%p138_p2), %vm1993_vm3, %v2958_v3, 0.0 }
 0xaec   :  { %v2020_v50 = vadd.f32 (%p138_p2), %v2019_v27, %v2018_v17 }
 0xaed   : > { %v1924_v9 = vsub.f32 %v1908_v30, %v1920_v42  ;;  %v1927_v39 = vmul.f32 %v1923_v15, %v1923_v15  ;;  %v2861_v30 = vmov (%p138_p2), 0  }
 0xaee   :  { %2735 = vset.pattern.permute.xlu1 (%p138_p2), %v2861_v30  ;;  %2736 = vset.pattern.permute.xlu0 (%p138_p2), %v2861_v30 }
 0xaef   : > { %1933 = vadd.xlane.f32.xlu1 %v1927_v39  ;;  %v1928_v31 = vmul.f32 %v1924_v9, %v1924_v9 }
 0xaf1   : > { %1935 = vadd.xlane.f32.xlu0 %v1928_v31 }
 0xb00   :  { %1971 = vperm.xlu1 (%p138_p2), %2735, %v2943_v0  }
 0xb04   :  { %1976 = vperm.xlu1 (%p138_p2), %2735, %v2948_v1  }
 0xb08   :  { %1986 = vperm.xlu1 (%p138_p2), %2735, %v2958_v3  }
 0xb74   : > { %v1930_v12 = vpop.xlane.xlu1 %1929 }
 0xb75   : > { %v1937_v56 = vmul.f32 0.0078125, %v1930_v12 }
 0xb76   : > { %v1932_v61 = vpop.xlane.xlu0 %1931 }
 0xb77   : > { %v1941_v26 = vadd.f32 1e-12, %v1937_v56  ;;  %v1938_v48 = vmul.f32 0.0078125, %v1932_v61 }
 0xb79   : > { %2726 = vrsqrt.f32 %v1941_v26  ;;  %v1942_v45 = vadd.f32 1e-12, %v1938_v48 }
 0xb7b   : > { %2728 = vrsqrt.f32 %v1942_v45 }
 0xb7c   : > { %v1934_v43 = vpop.xlane.xlu1 %1933 }
 0xb7d   : > { %v1939_v54 = vmul.f32 0.0078125, %v1934_v43 }
 0xb7e   : > { %v1936_v25 = vpop.xlane.xlu0 %1935 }
 0xb7f   : > { %v1943_v18 = vadd.f32 1e-12, %v1939_v54  ;;  %v1940_v49 = vmul.f32 0.0078125, %v1936_v25 }
 0xb80   :  { %v1972_v38 = vpop.permute.xlu1 (%p138_p2), %1971 }
 0xb81   : > { %2730 = vrsqrt.f32 %v1943_v18  ;;  %v1944_v59 = vadd.f32 1e-12, %v1940_v49 }
 0xb83   : > { %v2727_v51 = vpop.eup %2726  ;;  %2732 = vrsqrt.f32 %v1944_v59 }
 0xb84   : > { %v1949_v14 = vmul.f32 %v2727_v51, %v1921_v53  ;;  %v1977_v3 = vpop.permute.xlu1 (%p138_p2), %1976 }
 0xb85   : > { %v2729_v8 = vpop.eup %2728 }
 0xb86   : > { %v1957_v10 = vmul.f32 %v1956_v46, %v1949_v14  ;;  %v1950_v22 = vmul.f32 %v2729_v8, %v1922_v62 }
 0xb88   : > { %v1965_v21 = vadd.f32 %v1964_v23, %v1957_v10   ;;  %v1958_v47 = vmul.f32 %v1956_v46, %v1950_v22  ;;  %v1987_v35 = vpop.permute.xlu1 (%p138_p2), %1986 }
 0xb8a   : > { %v1966_v37 = vadd.f32 %v1964_v23, %v1958_v47   ;;  %v3537_v52 = vmov %v1965_v21  ;;  %v1989_v32 = vmul.f32 (%p138_p2), %v1972_v38, %v1965_v21 }
 0xb8b   : > { %v2731_v29 = vpop.eup %2730  ;;  %v1995_v52 = vsel (%p138_p2), %vm1993_vm3, %v2948_v1, 0.0 }
 0xb8c   : > { %v1951_v57 = vmul.f32 %v2731_v29, %v1923_v15  ;;  %v3536_v58 = vmov %v1966_v37  ;;  %v1996_v24 = vadd.f32 (%p138_p2), %v1995_v52, %v1994_v20 }
 0xb8d   : > { %v2733_v28 = vpop.eup %2732 }
 0xb8e   : > { %v1959_v13 = vmul.f32 %v1956_v46, %v1951_v57  ;;  %v1952_v16 = vmul.f32 %v2733_v28, %v1924_v9  ;;  %140 = sbr.rel (!%p138_p2) target bundleno = 360 (0x168), region = 77  ;;  %1997 = vadd.xlane.f32.xlu0 (%p138_p2), %v1996_v24 }
 0xb90   : > { %v1967_v19 = vadd.f32 %v1964_v23, %v1959_v13   ;;  %v1960_v55 = vmul.f32 %v1956_v46, %v1952_v16 }
 0xb92   : > { %v1968_v33 = vadd.f32 %v1964_v23, %v1960_v55   ;;  %v3535_v60 = vmov %v1967_v19  ;;  %2021 = vadd.xlane.f32.xlu0 (%p138_p2), %v2020_v50 }
 0xb94   : > { %v3534_v62 = vmov %v1968_v33  ;;  %v1992_v42 = vmul.f32 (%p138_p2), %v1987_v35, %v1968_v33 }
 0xba8   :  { %1981 = vperm.xlu0 %2736, %v2953_v2   ;;  %v1990_v2 = vmul.f32 %v1977_v3, %v1966_v37 }
 0xbaa   :  { %v2007_v63 = vadd.f32 %v1990_v2, %v1989_v32 }
 0xbac   :  { %v2008_v9 = vrot.slane %v2007_v63, 4 }
 0xbae   :  { %v2009_v31 = vadd.f32 %v2008_v9, %v2007_v63 }
 0xbb0   :  { %v2010_v56 = vrot.slane %v2009_v31, 2 }
 0xbb2   :  { %v2011_v48 = vadd.f32 %v2010_v56, %v2009_v31 }
 0xbb4   :  { %v2012_v54 = vrot.slane %v2011_v48, 1 }
 0xbb6   :  { %v2013_v18 = vadd.f32 %v2012_v54, %v2011_v48 }
 0xc1b   :  { %v1998_v4 = vpop.xlane.xlu0 %1997 }
 0xc1c   :  { %v1999_v5 = vrot.slane %v1998_v4, 4 }
 0xc1e   :  { %v2000_v6 = vadd.f32 %v1999_v5, %v1998_v4 }
 0xc1f   :  { %v2022_v7 = vpop.xlane.xlu0 %2021 }
 0xc20   :  { %v2001_v36 = vrot.slane %v2000_v6, 2  ;;  %v2023_v41 = vrot.slane %v2022_v7, 4 }
 0xc22   :  { %v2024_v44 = vadd.f32 %v2023_v41, %v2022_v7  ;;  %v2002_v58 = vadd.f32 %v2001_v36, %v2000_v6 }
 0xc24   :  { %v2025_v60 = vrot.slane %v2024_v44, 2  ;;  %v2003_v53 = vrot.slane %v2002_v58, 1 }
 0xc26   :  { %v2004_v0 = vadd.f32 %v2003_v53, %v2002_v58  ;;  %v2026_v40 = vadd.f32 %v2025_v60, %v2024_v44 }
 0xc27   :  { %v1982_v34 = vpop.permute.xlu0 %1981 }
 0xc28   :  { %2373 = vpush %v2004_v0  ;;  %v2027_v62 = vrot.slane %v2026_v40, 1  ;;  %v1991_v15 = vmul.f32 %v1982_v34, %v1967_v19 }
 0xc2a   :  { %v2028_v1 = vadd.f32 %v2027_v62, %v2026_v40  ;;  %v2031_v39 = vadd.f32 %v1992_v42, %v1991_v15 }
 0xc2c   :  { %2375 = vpush %v2028_v1  ;;  %v2032_v12 = vrot.slane %v2031_v39, 4 }
 0xc2e   :  { %v2033_v61 = vadd.f32 %v2032_v12, %v2031_v39 }
 0xc30   :  { %v2034_v45 = vrot.slane %v2033_v61, 2 }
 0xc32   :  { %v2035_v25 = vadd.f32 %v2034_v45, %v2033_v61 }
 0xc34   :  { %v2036_v11 = vrot.slane %v2035_v25, 1 }
 0xc36   :  { %v2037_v46 = vadd.f32 %v2036_v11, %v2035_v25 }
 0xc59   :  { %s2374_s4 = spop %2373 }
 0xc5a   :  { %s2006_s8 = smax.f32 %s2862_s6, %s2374_s4 }
 0xc5b   :  { %v2014_v26 = vstv %s2006_s8 }
 0xc5c   :  { %2737 = vrcp.f32 %v2014_v26 }
 0xc5d   :  { %s2376_s29 = spop %2375 }
 0xc5e   :  { %s2030_s30 = smax.f32 %s2862_s6, %s2376_s29 }
 0xc5f   :  { %v2038_v43 = vstv %s2030_s30 }
 0xc60   :  { %2739 = vrcp.f32 %v2038_v43 }
 0xc66   :  { %v2738_v49 = vpop.eup %2737 }
 0xc67   :  { %v2016_v59 = vmul.f32 %v2738_v49, %v2013_v18 }
 0xc69   :  { %2017 = vst [vmem:[#allocation7] sm:$0x1] %v2016_v59 }
 0xc6a   :  { %v2740_v51 = vpop.eup %2739 }
 0xc6b   :  { %v2040_v23 = vmul.f32 %v2740_v51, %v2037_v46 }
 0xc6d   :  { %2042 = vst [vmem:[#allocation7 + $0x1] sm:$0x1] %v2040_v23 }
 0xc6e   :  { %2796 = shalt.err (!%p2793_p7)
}
 0xc6f   :  { %s2797_s2 = scalar_lea.hbm %s3533_s9, 32 }
 0xc70   :  { %p2798_p8 = scmp.ne.s32.totalorder %s3533_s9, %s2797_s2  ;;  %p2801_p9 = scmp.lt.u32.totalorder %s2797_s2, %s3533_s9 }
 0xc72   :  { %p2803_p10 = pnand %p2801_p9, %p2798_p8 }
 0xc74   :  { %2806 = shalt.err (!%p2803_p10)
}
 0xc75   :  { %s2864_s16 = smov 16   ;;  %s2865_s17 = smov 1  }
 0xc76   :  { %2054 = dma.vmem_to_hbm [thread:$0]  %s2049_s12, 32, %s3533_s9, [#allocation4], %s2864_s16, %s2864_s16, %s2865_s17  }
 0xc77   :  { %2831 = dma.done.wait [#allocation4], 32  }
 0xc78   :  { %2832 = vsyncadd [#allocation4], 4294967264 }
 0xc79   :  { %2058 = vsyncpa [#allocation3], 1 }
 0xc7a   :  { %2059 = vsyncpa [#allocation6], 1 }
 0xc7b   :  { %2060 = vsyncpa [#allocation4], 1 }

</bundles_post_ra>
